<compile_context>
chip_gen: v7x
topology: tpu7x:2x2x1
jax: 0.10.0
libtpu: 0.0.40
codegen_flags: <defaults>
</compile_context>

<pallas_src>
import jax
import jax.numpy as jnp
from jax import lax
from jax.experimental import pallas as pl
from jax.experimental.pallas import tpu as pltpu


def _adapter_kernel(gav_ref, x_ref, vis_ref, tok_ref, tokT_ref, wdT_ref, wuT_ref,
                    b1_ref, b2_ref, o_ref):
    # gav_ref:  (1,) f32 in SMEM                      (gate_av scalar)
    # x_ref:    (Bb, Cin, L)   channel-first block    (NCHW minus trailing W==1)
    # vis_ref:  (Bb, Cin, N)
    # tok_ref:  (T, Cin) ; tokT_ref: (Cin, T)         learnable tokens (both orientations, tiny)
    # wdT_ref:  (down, Cin)  block-diag grouped down-conv weight, BN1 scale folded in
    # wuT_ref:  (Cout, down) block-diag grouped up-conv weight, gate*BN2 scale folded in
    # b1_ref:   (down, 1) f32  BN1 shift ; b2_ref: (Cout, 1) f32  gate*BN2 shift
    # o_ref:    (Bb, Cout, L)  channel-first output block
    gav = gav_ref[0]
    tok = tok_ref[...]
    tokT = tokT_ref[...]
    wdT = wdT_ref[...]
    wuT = wuT_ref[...]
    b1 = b1_ref[...]
    b2 = b2_ref[...]
    cdt = tok.dtype                       # MXU operand dtype (f32 or bf16)

    for b in range(x_ref.shape[0]):       # static unroll over the per-step batch block
        x_b = x_ref[b]                    # (Cin, L)
        vis_b = vis_ref[b]                # (Cin, N)

        # --- token <- visual-token cross attention (softmax over N, lane axis) ---------
        att1 = lax.dot_general(tok, vis_b, (((1,), (0,)), ((), ())),
                               preferred_element_type=jnp.float32)            # (T, N)
        att1 = att1 - jnp.max(att1, axis=-1, keepdims=True)
        e1 = jnp.exp(att1)
        # NOTE: approx=True would route the reciprocal to the (idle) EUP slot; kept exact so the
        # demo's tight f32 tolerance holds.
        p1 = (e1 * pl.reciprocal(jnp.sum(e1, axis=-1, keepdims=True), approx=False)
              ).astype(cdt)                                                   # (T, N)
        # rep (T, Cin) and repT (Cin, T), both via NT matmuls (no transposes needed).
        rep = tok.astype(jnp.float32) + lax.dot_general(
            p1, vis_b, (((1,), (1,)), ((), ())),
            preferred_element_type=jnp.float32)                               # (T, Cin)
        repT = tokT.astype(jnp.float32) + lax.dot_general(
            vis_b, p1, (((1,), (1,)), ((), ())),
            preferred_element_type=jnp.float32)                               # (Cin, T)

        # --- x <- token cross attention, kept transposed (softmax over T = axis 0) -----
        s = lax.dot_general(rep.astype(cdt), x_b, (((1,), (0,)), ((), ())),
                            preferred_element_type=jnp.float32)               # (T, L)
        e2 = jnp.exp(s - jnp.max(s, axis=0, keepdims=True))                   # (T, L)
        inv_den = pl.reciprocal(jnp.sum(e2, axis=0, keepdims=True),
                                approx=False)                                 # (1, L)

        # --- bottleneck: down conv -> BN1 -> ReLU -> up conv -> BN2 -> gate -------------
        #   zT = relu(WdT@x + (gate_av*WdT@repT) @ softmax(att2)^T + b1)
        rep_dT = gav * lax.dot_general(wdT, repT.astype(cdt), (((1,), (0,)), ((), ())),
                                       preferred_element_type=jnp.float32)    # (down, T)
        x_dT = lax.dot_general(wdT, x_b, (((1,), (0,)), ((), ())),
                               preferred_element_type=jnp.float32)            # (down, L)
        att_dT = lax.dot_general(rep_dT.astype(cdt), e2.astype(cdt),
                                 (((1,), (0,)), ((), ())),
                                 preferred_element_type=jnp.float32)          # (down, L)
        zT = jnp.maximum(x_dT + att_dT * inv_den + b1, 0.0)                   # (down, L)

        oT = lax.dot_general(wuT, zT.astype(cdt), (((1,), (0,)), ((), ())),
                             preferred_element_type=jnp.float32) + b2         # (Cout, L)
        o_ref[b] = oT.astype(o_ref.dtype)


def _block_diag_grouped_1x1(w, groups):
    """Grouped 1x1 conv weight (Cout, Cin//G, 1, 1) -> dense block-diagonal (Cout, Cin)."""
    cout, cin_g = int(w.shape[0]), int(w.shape[1])
    cout_g = cout // groups
    cin = cin_g * groups
    full = jnp.zeros((cout, cin), w.dtype)
    for g in range(groups):
        full = full.at[g * cout_g:(g + 1) * cout_g,
                       g * cin_g:(g + 1) * cin_g].set(w[g * cout_g:(g + 1) * cout_g, :, 0, 0])
    return full


def _bn_scale_shift(bn, eps):
    gamma, beta, mean, var = bn
    scale = gamma / jnp.sqrt(var + eps)
    return scale, beta - mean * scale


def visual_adapter_pallas(x, vis_token, my_tokens, gate_av, gate, w_down, w_up,
                          bn1, bn2, *, groups, eps=1e-5, block_b=8,
                          compute_dtype=jnp.float32):
    """VisualAdapter forward ('bottleneck', is_multimodal=True), BN in eval mode.

    x:         (B, Cin, L, 1)   NCHW with W==1, exactly as in the PyTorch module.
    vis_token: (B, Cin, N, 1)
    returns    (B, Cout, L, 1)
    """
    B, Cin, L, _ = x.shape
    N = vis_token.shape[2]
    T = my_tokens.shape[0]
    down = w_down.shape[0]
    Cout = w_up.shape[0]

    # Largest per-step batch block that divides B (bigger blocks amortize the ~0.35 us/step
    # overhead; pass a smaller block_b to keep >=2 grid steps for v7x's two TensorCores).
    bb = max(d for d in range(1, min(block_b, B) + 1) if B % d == 0)

    # Channel-first end-to-end: only the trailing W==1 axis is squeezed (free reshape),
    # no materialized transposes around the kernel.
    x3 = x[..., 0].astype(compute_dtype)             # (B, Cin, L)
    vis3 = vis_token[..., 0].astype(compute_dtype)   # (B, Cin, N)

    # Fold eval-mode BN into the block-diagonal grouped 1x1 conv weights; fold the output gate
    # into BN2's scale/shift so only two bias adds remain inside the kernel.
    s1, b1 = _bn_scale_shift(bn1, eps)
    s2, b2 = _bn_scale_shift(bn2, eps)
    s2 = gate * s2
    b2 = gate * b2
    wdT = (_block_diag_grouped_1x1(w_down, groups) * s1[:, None]).astype(compute_dtype)  # (down, Cin)
    wuT = (_block_diag_grouped_1x1(w_up, groups) * s2[:, None]).astype(compute_dtype)    # (Cout, down)
    b1c = b1.reshape(down, 1).astype(jnp.float32)
    b2c = b2.reshape(Cout, 1).astype(jnp.float32)

    tok = my_tokens.astype(compute_dtype)                    # (T, Cin)
    tokT = jnp.transpose(my_tokens).astype(compute_dtype)    # (Cin, T)  tiny, built once
    gav = jnp.asarray(gate_av, jnp.float32).reshape(1)

    out = pl.pallas_call(
        _adapter_kernel,
        out_shape=jax.ShapeDtypeStruct((B, Cout, L), x.dtype),
        grid_spec=pltpu.PrefetchScalarGridSpec(
            num_scalar_prefetch=0,
            grid=(B // bb,),
            in_specs=[
                pl.BlockSpec(memory_space=pltpu.MemorySpace.SMEM),    # gate_av scalar
                pl.BlockSpec((bb, Cin, L), lambda i: (i, 0, 0)),      # x          (NCHW)
                pl.BlockSpec((bb, Cin, N), lambda i: (i, 0, 0)),      # vis_token  (NCHW)
                pl.BlockSpec((T, Cin), lambda i: (0, 0)),             # my_tokens
                pl.BlockSpec((Cin, T), lambda i: (0, 0)),             # my_tokens^T
                pl.BlockSpec((down, Cin), lambda i: (0, 0)),          # WdT (BN1 scale folded)
                pl.BlockSpec((Cout, down), lambda i: (0, 0)),         # WuT (gate*BN2 scale folded)
                pl.BlockSpec((down, 1), lambda i: (0, 0)),            # BN1 shift
                pl.BlockSpec((Cout, 1), lambda i: (0, 0)),            # gate*BN2 shift
            ],
            out_specs=pl.BlockSpec((bb, Cout, L), lambda i: (i, 0, 0)),
        ),
        # NOTE: for production shapes (multi-MiB blocks) also set vmem_limit_bytes here,
        # especially on v5e (16 MiB default scoped VMEM) and v7x (64 MiB physical VMEM).
        compiler_params=pltpu.CompilerParams(dimension_semantics=("parallel",)),
    )(gav, x3, vis3, tok, tokT, wdT, wuT, b1c, b2c)

    return out[..., None]          # (B, Cout, L, 1) — free reshape, no transpose


# ----------------------------- pure-JAX reference -----------------------------------
def _grouped_conv1x1_nchw(x, w, groups):
    # x: (B, Cin, L, 1); w: (Cout, Cin//G, 1, 1)
    cout, cin_g = w.shape[0], w.shape[1]
    cout_g = cout // groups
    outs = []
    for g in range(groups):
        xg = x[:, g * cin_g:(g + 1) * cin_g, :, 0]           # (B, cin_g, L)
        wg = w[g * cout_g:(g + 1) * cout_g, :, 0, 0]         # (cout_g, cin_g)
        outs.append(jnp.einsum("oc,bcl->bol", wg, xg))
    return jnp.concatenate(outs, axis=1)[..., None]


def _bn_eval_nchw(x, bn, eps):
    gamma, beta, mean, var = bn
    inv = gamma / jnp.sqrt(var + eps)
    return ((x - mean[None, :, None, None]) * inv[None, :, None, None]
            + beta[None, :, None, None])


def _reference(x, vis_token, p, groups, eps):
    # Mirrors the PyTorch forward (bottleneck + multimodal), NCHW layout.
    B = x.shape[0]
    rep = jnp.broadcast_to(p["my_tokens"][None], (B,) + p["my_tokens"].shape)
    vis = vis_token[..., 0]                                               # (B, D, N)
    att_v2tk = jax.nn.softmax(jnp.einsum("btd,bdn->btn", rep, vis), axis=-1)
    rep = rep + jnp.einsum("btn,bnd->btd", att_v2tk,
                           jnp.transpose(vis, (0, 2, 1)))
    xt = jnp.transpose(x[..., 0], (0, 2, 1))                              # (B, L, D)
    att_tk2x = jax.nn.softmax(jnp.einsum("bld,btd->blt", xt, rep), axis=-1)
    x_res = jnp.einsum("blt,btd->bld", att_tk2x, rep)                     # (B, L, D)
    x_new = x + p["gate_av"] * jnp.transpose(x_res, (0, 2, 1))[..., None]
    z = _grouped_conv1x1_nchw(x_new, p["w_down"], groups)
    z = jnp.maximum(_bn_eval_nchw(z, p["bn1"], eps), 0.0)
    out = _grouped_conv1x1_nchw(z, p["w_up"], groups)
    out = _bn_eval_nchw(out, p["bn2"], eps)
    return p["gate"] * out


if __name__ == "__main__":
    # Config: adapter_kind='bottleneck', is_multimodal=True, use_bn=True, use_gate=True,
    # is_before_layernorm=False, is_post_layernorm=False.
    B = 2
    input_dim = 128
    output_dim = 128
    reduction_factor = 16
    down_size = input_dim // reduction_factor    # 8
    groups = 2                                   # opt.num_conv_group
    num_tokens = 8                               # opt.num_tokens
    L = 16                                       # x spatial tokens (H dim, W==1)
    N = 8                                        # vis_token length
    eps = 1e-5

    key = jax.random.PRNGKey(0)
    ks = jax.random.split(key, 12)

    x = jax.random.normal(ks[0], (B, input_dim, L, 1), jnp.float32)
    vis_token = jax.random.normal(ks[1], (B, input_dim, N, 1), jnp.float32)

    # PyTorch initializes my_tokens / gate / gate_av to zeros, which would zero out the
    # interesting paths; use small nonzero values so the check is real.
    my_tokens = 0.1 * jax.random.normal(ks[2], (num_tokens, input_dim), jnp.float32)
    gate_av = 0.5 + 0.1 * jax.random.normal(ks[3], (), jnp.float32)
    gate = 0.7 + 0.1 * jax.random.normal(ks[4], (), jnp.float32)
    w_down = 0.05 * jax.random.normal(
        ks[5], (down_size, input_dim // groups, 1, 1), jnp.float32)
    w_up = 0.05 * jax.random.normal(
        ks[6], (output_dim, down_size // groups, 1, 1), jnp.float32)
    bn1 = (1.0 + 0.1 * jax.random.normal(ks[7], (down_size,), jnp.float32),   # gamma
           0.1 * jax.random.normal(ks[8], (down_size,), jnp.float32),         # beta
           0.1 * jax.random.normal(ks[9], (down_size,), jnp.float32),         # running mean
           0.5 + jax.random.uniform(ks[10], (down_size,), jnp.float32))       # running var
    kb = jax.random.split(ks[11], 4)
    bn2 = (1.0 + 0.1 * jax.random.normal(kb[0], (output_dim,), jnp.float32),
           0.1 * jax.random.normal(kb[1], (output_dim,), jnp.float32),
           0.1 * jax.random.normal(kb[2], (output_dim,), jnp.float32),
           0.5 + jax.random.uniform(kb[3], (output_dim,), jnp.float32))

    params = dict(my_tokens=my_tokens, gate_av=gate_av, gate=gate,
                  w_down=w_down, w_up=w_up, bn1=bn1, bn2=bn2)
    ref = _reference(x, vis_token, params, groups, eps)

    def run(**kw):
        return jax.block_until_ready(visual_adapter_pallas(
            x, vis_token, my_tokens, gate_av, gate, w_down, w_up, bn1, bn2,
            groups=groups, eps=eps, **kw))

    # 1) f32 MXU path, whole batch in one grid step (exercises the in-kernel batch loop).
    out = run(compute_dtype=jnp.float32, block_b=8)
    assert out.shape == (B, output_dim, L, 1)
    assert jnp.allclose(out, ref, atol=1e-3, rtol=1e-3), "f32 (block_b=2) mismatch"

    # 2) f32, two grid steps (exercises the parallel batch grid axis / megacore sharding path).
    out2 = run(compute_dtype=jnp.float32, block_b=1)
    assert jnp.allclose(out2, ref, atol=1e-3, rtol=1e-3), "f32 (block_b=1) mismatch"

    # 3) bf16 MXU operands with f32 accumulation (v6e/v7x fast path); looser tolerance expected.
    out16 = run(compute_dtype=jnp.bfloat16, block_b=8)
    assert jnp.allclose(out16, ref, atol=3e-2, rtol=3e-2), "bf16 mismatch"

    print("KERNEL_OK")
</pallas_src>

<mosaic_0001>
module attributes {stable_mosaic.version = 11 : i64} {
  func.func @_adapter_kernel(%arg0: i32, %arg1: memref<1xf32, #tpu.memory_space<smem>>, %arg2: memref<2x128x16xf32, #tpu.memory_space<vmem>>, %arg3: memref<2x128x8xf32, #tpu.memory_space<vmem>>, %arg4: memref<8x128xf32, #tpu.memory_space<vmem>>, %arg5: memref<128x8xf32, #tpu.memory_space<vmem>>, %arg6: memref<8x128xf32, #tpu.memory_space<vmem>>, %arg7: memref<128x8xf32, #tpu.memory_space<vmem>>, %arg8: memref<8x1xf32, #tpu.memory_space<vmem>>, %arg9: memref<128x1xf32, #tpu.memory_space<vmem>>, %arg10: memref<2x128x16xf32, #tpu.memory_space<vmem>>) attributes {dimension_semantics = [#tpu.dimension_semantics<parallel>], iteration_bounds = array<i64: 1>, scalar_prefetch = 0 : i64, scratch_operands = 0 : i64, tpu.core_type = #tpu.core_type<tc>, window_params = [{transform_indices = @transform_0, window_bounds = array<i64: 1>}, {transform_indices = @transform_1, window_bounds = array<i64: 2, 128, 16>}, {transform_indices = @transform_2, window_bounds = array<i64: 2, 128, 8>}, {pipeline_mode = #tpu.pipeline_mode<synchronous>, transform_indices = @transform_3, window_bounds = array<i64: 8, 128>}, {pipeline_mode = #tpu.pipeline_mode<synchronous>, transform_indices = @transform_4, window_bounds = array<i64: 128, 8>}, {pipeline_mode = #tpu.pipeline_mode<synchronous>, transform_indices = @transform_5, window_bounds = array<i64: 8, 128>}, {pipeline_mode = #tpu.pipeline_mode<synchronous>, transform_indices = @transform_6, window_bounds = array<i64: 128, 8>}, {pipeline_mode = #tpu.pipeline_mode<synchronous>, transform_indices = @transform_7, window_bounds = array<i64: 8, 1>}, {pipeline_mode = #tpu.pipeline_mode<synchronous>, transform_indices = @transform_8, window_bounds = array<i64: 128, 1>}, {transform_indices = @transform_9, window_bounds = array<i64: 2, 128, 16>}]} {
    %c0 = arith.constant 0 : index
    %0 = memref.load %arg1[%c0] : memref<1xf32, #tpu.memory_space<smem>>
    %c0_0 = arith.constant 0 : index
    %c0_1 = arith.constant 0 : index
    %1 = vector.load %arg4[%c0_0, %c0_1] : memref<8x128xf32, #tpu.memory_space<vmem>>, vector<8x128xf32>
    %c0_2 = arith.constant 0 : index
    %c0_3 = arith.constant 0 : index
    %2 = vector.load %arg5[%c0_2, %c0_3] : memref<128x8xf32, #tpu.memory_space<vmem>>, vector<128x8xf32>
    %c0_4 = arith.constant 0 : index
    %c0_5 = arith.constant 0 : index
    %3 = vector.load %arg6[%c0_4, %c0_5] : memref<8x128xf32, #tpu.memory_space<vmem>>, vector<8x128xf32>
    %c0_6 = arith.constant 0 : index
    %c0_7 = arith.constant 0 : index
    %4 = vector.load %arg7[%c0_6, %c0_7] : memref<128x8xf32, #tpu.memory_space<vmem>>, vector<128x8xf32>
    %c0_8 = arith.constant 0 : index
    %c0_9 = arith.constant 0 : index
    %5 = vector.load %arg8[%c0_8, %c0_9] : memref<8x1xf32, #tpu.memory_space<vmem>>, vector<8x1xf32>
    %c0_10 = arith.constant 0 : index
    %c0_11 = arith.constant 0 : index
    %6 = vector.load %arg9[%c0_10, %c0_11] : memref<128x1xf32, #tpu.memory_space<vmem>>, vector<128x1xf32>
    %c0_12 = arith.constant 0 : index
    %c0_13 = arith.constant 0 : index
    %c0_14 = arith.constant 0 : index
    %7 = vector.load %arg2[%c0_12, %c0_13, %c0_14] : memref<2x128x16xf32, #tpu.memory_space<vmem>>, vector<1x128x16xf32>
    %8 = vector.shape_cast %7 : vector<1x128x16xf32> to vector<128x16xf32>
    %c0_15 = arith.constant 0 : index
    %c0_16 = arith.constant 0 : index
    %c0_17 = arith.constant 0 : index
    %9 = vector.load %arg3[%c0_15, %c0_16, %c0_17] : memref<2x128x8xf32, #tpu.memory_space<vmem>>, vector<1x128x8xf32>
    %10 = vector.shape_cast %9 : vector<1x128x8xf32> to vector<128x8xf32>
    %cst = arith.constant dense<0.000000e+00> : vector<8x8xf32>
    %11 = tpu.matmul %1, %10, %cst {dimension_numbers = #tpu.dot_dimension_numbers<[1], [0], [0], [1], [0, 0, 1, 1], [], []>} : vector<8x128xf32>, vector<128x8xf32>, vector<8x8xf32> -> vector<8x8xf32>
    %cst_18 = arith.constant dense<0xFF800000> : vector<8xf32>
    %12 = vector.multi_reduction <maximumf>, %11, %cst_18 [1] : vector<8x8xf32> to vector<8xf32>
    %13 = vector.shape_cast %12 : vector<8xf32> to vector<8x1xf32>
    %14 = vector.broadcast %13 : vector<8x1xf32> to vector<8x8xf32>
    %15 = arith.subf %11, %14 : vector<8x8xf32>
    %16 = math.exp %15 : vector<8x8xf32>
    %cst_19 = arith.constant dense<0.000000e+00> : vector<8xf32>
    %17 = vector.multi_reduction <add>, %16, %cst_19 [1] : vector<8x8xf32> to vector<8xf32>
    %18 = vector.shape_cast %17 : vector<8xf32> to vector<8x1xf32>
    %19 = tpu.reciprocal %18 : vector<8x1xf32> -> vector<8x1xf32>
    %20 = vector.broadcast %19 : vector<8x1xf32> to vector<8x8xf32>
    %21 = arith.mulf %16, %20 : vector<8x8xf32>
    %cst_20 = arith.constant dense<0.000000e+00> : vector<8x128xf32>
    %22 = tpu.matmul %21, %10, %cst_20 {dimension_numbers = #tpu.dot_dimension_numbers<[1], [1], [0], [0], [0, 0, 1, 0], [], []>} : vector<8x8xf32>, vector<128x8xf32>, vector<8x128xf32> -> vector<8x128xf32>
    %23 = arith.addf %1, %22 : vector<8x128xf32>
    %cst_21 = arith.constant dense<0.000000e+00> : vector<128x8xf32>
    %24 = tpu.matmul %10, %21, %cst_21 {dimension_numbers = #tpu.dot_dimension_numbers<[1], [1], [0], [0], [0, 0, 1, 0], [], []>} : vector<128x8xf32>, vector<8x8xf32>, vector<128x8xf32> -> vector<128x8xf32>
    %25 = arith.addf %2, %24 : vector<128x8xf32>
    %cst_22 = arith.constant dense<0.000000e+00> : vector<8x16xf32>
    %26 = tpu.matmul %23, %8, %cst_22 {dimension_numbers = #tpu.dot_dimension_numbers<[1], [0], [0], [1], [0, 0, 1, 1], [], []>} : vector<8x128xf32>, vector<128x16xf32>, vector<8x16xf32> -> vector<8x16xf32>
    %cst_23 = arith.constant dense<0xFF800000> : vector<16xf32>
    %27 = vector.multi_reduction <maximumf>, %26, %cst_23 [0] : vector<8x16xf32> to vector<16xf32>
    %28 = vector.shape_cast %27 : vector<16xf32> to vector<1x16xf32>
    %29 = vector.broadcast %28 : vector<1x16xf32> to vector<8x16xf32>
    %30 = arith.subf %26, %29 : vector<8x16xf32>
    %31 = math.exp %30 : vector<8x16xf32>
    %cst_24 = arith.constant dense<0.000000e+00> : vector<16xf32>
    %32 = vector.multi_reduction <add>, %31, %cst_24 [0] : vector<8x16xf32> to vector<16xf32>
    %33 = vector.shape_cast %32 : vector<16xf32> to vector<1x16xf32>
    %34 = tpu.reciprocal %33 : vector<1x16xf32> -> vector<1x16xf32>
    %cst_25 = arith.constant dense<0.000000e+00> : vector<8x8xf32>
    %35 = tpu.matmul %3, %25, %cst_25 {dimension_numbers = #tpu.dot_dimension_numbers<[1], [0], [0], [1], [0, 0, 1, 1], [], []>} : vector<8x128xf32>, vector<128x8xf32>, vector<8x8xf32> -> vector<8x8xf32>
    %36 = vector.broadcast %0 : f32 to vector<8x8xf32>
    %37 = arith.mulf %36, %35 : vector<8x8xf32>
    %cst_26 = arith.constant dense<0.000000e+00> : vector<8x16xf32>
    %38 = tpu.matmul %3, %8, %cst_26 {dimension_numbers = #tpu.dot_dimension_numbers<[1], [0], [0], [1], [0, 0, 1, 1], [], []>} : vector<8x128xf32>, vector<128x16xf32>, vector<8x16xf32> -> vector<8x16xf32>
    %cst_27 = arith.constant dense<0.000000e+00> : vector<8x16xf32>
    %39 = tpu.matmul %37, %31, %cst_27 {dimension_numbers = #tpu.dot_dimension_numbers<[1], [0], [0], [1], [0, 0, 1, 1], [], []>} : vector<8x8xf32>, vector<8x16xf32>, vector<8x16xf32> -> vector<8x16xf32>
    %40 = vector.broadcast %34 : vector<1x16xf32> to vector<8x16xf32>
    %41 = arith.mulf %39, %40 : vector<8x16xf32>
    %42 = arith.addf %38, %41 : vector<8x16xf32>
    %43 = vector.broadcast %5 : vector<8x1xf32> to vector<8x16xf32>
    %44 = arith.addf %42, %43 : vector<8x16xf32>
    %cst_28 = arith.constant 0.000000e+00 : f32
    %45 = vector.broadcast %cst_28 : f32 to vector<8x16xf32>
    %46 = arith.maximumf %44, %45 : vector<8x16xf32>
    %cst_29 = arith.constant dense<0.000000e+00> : vector<128x16xf32>
    %47 = tpu.matmul %4, %46, %cst_29 {dimension_numbers = #tpu.dot_dimension_numbers<[1], [0], [0], [1], [0, 0, 1, 1], [], []>} : vector<128x8xf32>, vector<8x16xf32>, vector<128x16xf32> -> vector<128x16xf32>
    %48 = vector.broadcast %6 : vector<128x1xf32> to vector<128x16xf32>
    %49 = arith.addf %47, %48 : vector<128x16xf32>
    %c0_30 = arith.constant 0 : index
    %c0_31 = arith.constant 0 : index
    %c0_32 = arith.constant 0 : index
    %50 = vector.load %arg10[%c0_30, %c0_31, %c0_32] : memref<2x128x16xf32, #tpu.memory_space<vmem>>, vector<1x128x16xf32>
    %51 = vector.shape_cast %50 : vector<1x128x16xf32> to vector<128x16xf32>
    %52 = vector.shape_cast %49 : vector<128x16xf32> to vector<1x128x16xf32>
    tpu.vector_store %arg10[%c0_30, %c0_31, %c0_32], %52 {strides = array<i32>} : memref<2x128x16xf32, #tpu.memory_space<vmem>>, vector<1x128x16xf32>,
    %c1 = arith.constant 1 : index
    %c0_33 = arith.constant 0 : index
    %c0_34 = arith.constant 0 : index
    %53 = vector.load %arg2[%c1, %c0_33, %c0_34] : memref<2x128x16xf32, #tpu.memory_space<vmem>>, vector<1x128x16xf32>
    %54 = vector.shape_cast %53 : vector<1x128x16xf32> to vector<128x16xf32>
    %c1_35 = arith.constant 1 : index
    %c0_36 = arith.constant 0 : index
    %c0_37 = arith.constant 0 : index
    %55 = vector.load %arg3[%c1_35, %c0_36, %c0_37] : memref<2x128x8xf32, #tpu.memory_space<vmem>>, vector<1x128x8xf32>
    %56 = vector.shape_cast %55 : vector<1x128x8xf32> to vector<128x8xf32>
    %cst_38 = arith.constant dense<0.000000e+00> : vector<8x8xf32>
    %57 = tpu.matmul %1, %56, %cst_38 {dimension_numbers = #tpu.dot_dimension_numbers<[1], [0], [0], [1], [0, 0, 1, 1], [], []>} : vector<8x128xf32>, vector<128x8xf32>, vector<8x8xf32> -> vector<8x8xf32>
    %cst_39 = arith.constant dense<0xFF800000> : vector<8xf32>
    %58 = vector.multi_reduction <maximumf>, %57, %cst_39 [1] : vector<8x8xf32> to vector<8xf32>
    %59 = vector.shape_cast %58 : vector<8xf32> to vector<8x1xf32>
    %60 = vector.broadcast %59 : vector<8x1xf32> to vector<8x8xf32>
    %61 = arith.subf %57, %60 : vector<8x8xf32>
    %62 = math.exp %61 : vector<8x8xf32>
    %cst_40 = arith.constant dense<0.000000e+00> : vector<8xf32>
    %63 = vector.multi_reduction <add>, %62, %cst_40 [1] : vector<8x8xf32> to vector<8xf32>
    %64 = vector.shape_cast %63 : vector<8xf32> to vector<8x1xf32>
    %65 = tpu.reciprocal %64 : vector<8x1xf32> -> vector<8x1xf32>
    %66 = vector.broadcast %65 : vector<8x1xf32> to vector<8x8xf32>
    %67 = arith.mulf %62, %66 : vector<8x8xf32>
    %cst_41 = arith.constant dense<0.000000e+00> : vector<8x128xf32>
    %68 = tpu.matmul %67, %56, %cst_41 {dimension_numbers = #tpu.dot_dimension_numbers<[1], [1], [0], [0], [0, 0, 1, 0], [], []>} : vector<8x8xf32>, vector<128x8xf32>, vector<8x128xf32> -> vector<8x128xf32>
    %69 = arith.addf %1, %68 : vector<8x128xf32>
    %cst_42 = arith.constant dense<0.000000e+00> : vector<128x8xf32>
    %70 = tpu.matmul %56, %67, %cst_42 {dimension_numbers = #tpu.dot_dimension_numbers<[1], [1], [0], [0], [0, 0, 1, 0], [], []>} : vector<128x8xf32>, vector<8x8xf32>, vector<128x8xf32> -> vector<128x8xf32>
    %71 = arith.addf %2, %70 : vector<128x8xf32>
    %cst_43 = arith.constant dense<0.000000e+00> : vector<8x16xf32>
    %72 = tpu.matmul %69, %54, %cst_43 {dimension_numbers = #tpu.dot_dimension_numbers<[1], [0], [0], [1], [0, 0, 1, 1], [], []>} : vector<8x128xf32>, vector<128x16xf32>, vector<8x16xf32> -> vector<8x16xf32>
    %cst_44 = arith.constant dense<0xFF800000> : vector<16xf32>
    %73 = vector.multi_reduction <maximumf>, %72, %cst_44 [0] : vector<8x16xf32> to vector<16xf32>
    %74 = vector.shape_cast %73 : vector<16xf32> to vector<1x16xf32>
    %75 = vector.broadcast %74 : vector<1x16xf32> to vector<8x16xf32>
    %76 = arith.subf %72, %75 : vector<8x16xf32>
    %77 = math.exp %76 : vector<8x16xf32>
    %cst_45 = arith.constant dense<0.000000e+00> : vector<16xf32>
    %78 = vector.multi_reduction <add>, %77, %cst_45 [0] : vector<8x16xf32> to vector<16xf32>
    %79 = vector.shape_cast %78 : vector<16xf32> to vector<1x16xf32>
    %80 = tpu.reciprocal %79 : vector<1x16xf32> -> vector<1x16xf32>
    %cst_46 = arith.constant dense<0.000000e+00> : vector<8x8xf32>
    %81 = tpu.matmul %3, %71, %cst_46 {dimension_numbers = #tpu.dot_dimension_numbers<[1], [0], [0], [1], [0, 0, 1, 1], [], []>} : vector<8x128xf32>, vector<128x8xf32>, vector<8x8xf32> -> vector<8x8xf32>
    %82 = vector.broadcast %0 : f32 to vector<8x8xf32>
    %83 = arith.mulf %82, %81 : vector<8x8xf32>
    %cst_47 = arith.constant dense<0.000000e+00> : vector<8x16xf32>
    %84 = tpu.matmul %3, %54, %cst_47 {dimension_numbers = #tpu.dot_dimension_numbers<[1], [0], [0], [1], [0, 0, 1, 1], [], []>} : vector<8x128xf32>, vector<128x16xf32>, vector<8x16xf32> -> vector<8x16xf32>
    %cst_48 = arith.constant dense<0.000000e+00> : vector<8x16xf32>
    %85 = tpu.matmul %83, %77, %cst_48 {dimension_numbers = #tpu.dot_dimension_numbers<[1], [0], [0], [1], [0, 0, 1, 1], [], []>} : vector<8x8xf32>, vector<8x16xf32>, vector<8x16xf32> -> vector<8x16xf32>
    %86 = vector.broadcast %80 : vector<1x16xf32> to vector<8x16xf32>
    %87 = arith.mulf %85, %86 : vector<8x16xf32>
    %88 = arith.addf %84, %87 : vector<8x16xf32>
    %89 = vector.broadcast %5 : vector<8x1xf32> to vector<8x16xf32>
    %90 = arith.addf %88, %89 : vector<8x16xf32>
    %cst_49 = arith.constant 0.000000e+00 : f32
    %91 = vector.broadcast %cst_49 : f32 to vector<8x16xf32>
    %92 = arith.maximumf %90, %91 : vector<8x16xf32>
    %cst_50 = arith.constant dense<0.000000e+00> : vector<128x16xf32>
    %93 = tpu.matmul %4, %92, %cst_50 {dimension_numbers = #tpu.dot_dimension_numbers<[1], [0], [0], [1], [0, 0, 1, 1], [], []>} : vector<128x8xf32>, vector<8x16xf32>, vector<128x16xf32> -> vector<128x16xf32>
    %94 = vector.broadcast %6 : vector<128x1xf32> to vector<128x16xf32>
    %95 = arith.addf %93, %94 : vector<128x16xf32>
    %c1_51 = arith.constant 1 : index
    %c0_52 = arith.constant 0 : index
    %c0_53 = arith.constant 0 : index
    %96 = vector.load %arg10[%c1_51, %c0_52, %c0_53] : memref<2x128x16xf32, #tpu.memory_space<vmem>>, vector<1x128x16xf32>
    %97 = vector.shape_cast %96 : vector<1x128x16xf32> to vector<128x16xf32>
    %98 = vector.shape_cast %95 : vector<128x16xf32> to vector<1x128x16xf32>
    tpu.vector_store %arg10[%c1_51, %c0_52, %c0_53], %98 {strides = array<i32>} : memref<2x128x16xf32, #tpu.memory_space<vmem>>, vector<1x128x16xf32>,
    return
  }
  func.func @transform_0(%arg0: i32) -> i32 {
    %c0_i32 = arith.constant 0 : i32
    %c0_i32_0 = arith.constant 0 : i32
    return %c0_i32 : i32
  }
  func.func @transform_1(%arg0: i32) -> (i32, i32, i32) {
    %c0_i32 = arith.constant 0 : i32
    %c0_i32_0 = arith.constant 0 : i32
    %c0_i32_1 = arith.constant 0 : i32
    return %arg0, %c0_i32, %c0_i32_0 : i32, i32, i32
  }
  func.func @transform_2(%arg0: i32) -> (i32, i32, i32) {
    %c0_i32 = arith.constant 0 : i32
    %c0_i32_0 = arith.constant 0 : i32
    %c0_i32_1 = arith.constant 0 : i32
    return %arg0, %c0_i32, %c0_i32_0 : i32, i32, i32
  }
  func.func @transform_3(%arg0: i32) -> (i32, i32) {
    %c0_i32 = arith.constant 0 : i32
    %c0_i32_0 = arith.constant 0 : i32
    %c0_i32_1 = arith.constant 0 : i32
    return %c0_i32, %c0_i32_0 : i32, i32
  }
  func.func @transform_4(%arg0: i32) -> (i32, i32) {
    %c0_i32 = arith.constant 0 : i32
    %c0_i32_0 = arith.constant 0 : i32
    %c0_i32_1 = arith.constant 0 : i32
    return %c0_i32, %c0_i32_0 : i32, i32
  }
  func.func @transform_5(%arg0: i32) -> (i32, i32) {
    %c0_i32 = arith.constant 0 : i32
    %c0_i32_0 = arith.constant 0 : i32
    %c0_i32_1 = arith.constant 0 : i32
    return %c0_i32, %c0_i32_0 : i32, i32
  }
  func.func @transform_6(%arg0: i32) -> (i32, i32) {
    %c0_i32 = arith.constant 0 : i32
    %c0_i32_0 = arith.constant 0 : i32
    %c0_i32_1 = arith.constant 0 : i32
    return %c0_i32, %c0_i32_0 : i32, i32
  }
  func.func @transform_7(%arg0: i32) -> (i32, i32) {
    %c0_i32 = arith.constant 0 : i32
    %c0_i32_0 = arith.constant 0 : i32
    %c0_i32_1 = arith.constant 0 : i32
    return %c0_i32, %c0_i32_0 : i32, i32
  }
  func.func @transform_8(%arg0: i32) -> (i32, i32) {
    %c0_i32 = arith.constant 0 : i32
    %c0_i32_0 = arith.constant 0 : i32
    %c0_i32_1 = arith.constant 0 : i32
    return %c0_i32, %c0_i32_0 : i32, i32
  }
  func.func @transform_9(%arg0: i32) -> (i32, i32, i32) {
    %c0_i32 = arith.constant 0 : i32
    %c0_i32_0 = arith.constant 0 : i32
    %c0_i32_1 = arith.constant 0 : i32
    return %arg0, %c0_i32, %c0_i32_0 : i32, i32, i32
  }
}

</mosaic_0001>

<bundles_post_ra>
// kernel: tpu_custom_call.1
= control target key start
LH: loop header
LB: loop body
LE: loop exit
PB: predicated region body
PF: predicated region fallthrough
CT: control target
= control target key end

     0   :  { %v4316_v0 = vmov 0.0|0.0   ;;  %vm3090_vm0 = vmmov 0   ;;  %v4318_v4 = vmov 0.0   ;;  %vm187_vm1 = vcmask 64512   ;;  %s4305_s2 = inlined_call_operand.vmem [shape: f32[2,128,8], index: 2, kind: input, shape index: {}]   ;;  %s4306_s3 = inlined_call_operand.vmem [shape: f32[8,128], index: 3, kind: input, shape index: {}]   ;;  %s4307_s1 = inlined_call_operand.vmem [shape: f32[2,128,16], index: 1, kind: input, shape index: {}]   ;;  %s4308_s4 = inlined_call_operand.vmem [shape: f32[128,8], index: 4, kind: input, shape index: {}]   ;;  %s4309_s5 = inlined_call_operand.vmem [shape: f32[8,128], index: 5, kind: input, shape index: {}]   ;;  %s4310_s7 = inlined_call_operand.vmem [shape: f32[8,1], index: 7, kind: input, shape index: {}]   ;;  %s4311_s0 = inlined_call_operand.<no memory space> [shape: f32[1], index: 0, kind: input, shape index: {}]   ;;  %s4312_s6 = inlined_call_operand.vmem [shape: f32[128,8], index: 6, kind: input, shape index: {}]   ;;  %s4313_s8 = inlined_call_operand.vmem [shape: f32[128,1], index: 8, kind: input, shape index: {}]   ;;  %s4314_s9 = inlined_call_operand.vmem [shape: f32[2,128,16], index: 9, kind: output, shape index: {}]  }
   0x1   :  { %2808 = vmatprep.subr.bf16.mxu0 %v4316_v0  ;;  %v101_v1 = vld [vmem:[%s4305_s2] sm:$0xff]  ;;  %v3150_v2 = vld [vmem:[%s4305_s2 + $0x8] sm:$0xff]  ;;  %v3155_v3 = vld [vmem:[%s4305_s2 + $0x10] sm:$0xff]  ;;  %2376 = vmatprep.mubr.msk.f32.mxu0 %vm3090_vm0, %v4318_v4  ;;  %vm552_vm3 = vcmask 130048  }
   0x2   :  { %v2809_v5 = vpack.c.bf16 %v3150_v2, %v101_v1  ;;  %v3163_v6 = vld [vmem:[%s4305_s2 + $0x18] sm:$0xff]  ;;  %2832 = vmatprep.subr.bf16.mxu1 %v4316_v0  ;;  %2411 = vmatprep.mubr.msk.f32.mxu1 %vm3090_vm0, %v4318_v4  ;;  %v3174_v8 = vld [vmem:[%s4305_s2 + $0x20] sm:$0xff]  ;;  %v3179_v9 = vld [vmem:[%s4305_s2 + $0x28] sm:$0xff] }
   0x3   :  { %v2812_v7 = vpack.c.bf16 %v3163_v6, %v3155_v3  ;;  %v2815_v10 = vpack.c.bf16 %v3179_v9, %v3174_v8  ;;  %v3187_v11 = vld [vmem:[%s4305_s2 + $0x30] sm:$0xff]  ;;  %v3192_v12 = vld [vmem:[%s4305_s2 + $0x38] sm:$0xff]  ;;  %v3200_v14 = vld [vmem:[%s4305_s2 + $0x40] sm:$0xff] }
   0x4   :  { %2810 = vmatpush3.bf16.msra.mxu0 %v2809_v5  ;;  %v2818_v13 = vpack.c.bf16 %v3192_v12, %v3187_v11  ;;  %v3205_v15 = vld [vmem:[%s4305_s2 + $0x48] sm:$0xff]  ;;  %v3213_v17 = vld [vmem:[%s4305_s2 + $0x50] sm:$0xff]  ;;  %v3218_v18 = vld [vmem:[%s4305_s2 + $0x58] sm:$0xff] }
   0x5   :  { %2811 = vmatprep.subr.bf16.mxu0 %v4316_v0  ;;  %v2821_v16 = vpack.c.bf16 %v3205_v15, %v3200_v14  ;;  %v2824_v19 = vpack.c.bf16 %v3218_v18, %v3213_v17  ;;  %v3226_v20 = vld [vmem:[%s4305_s2 + $0x60] sm:$0xff]  ;;  %v3231_v21 = vld [vmem:[%s4305_s2 + $0x68] sm:$0xff]  ;;  %v3239_v23 = vld [vmem:[%s4305_s2 + $0x70] sm:$0xff] }
   0x6   :  { %v2827_v22 = vpack.c.bf16 %v3231_v21, %v3226_v20  ;;  %v3244_v24 = vld [vmem:[%s4305_s2 + $0x78] sm:$0xff]  ;;  %v3252_v26 = vld [vmem:[%s4306_s3] sm:$0xff]  ;;  %vm3259_vm2 = vmpackc.low %vm187_vm1, %vm187_vm1 }
   0x7   :  { %v2830_v25 = vpack.c.bf16 %v3244_v24, %v3239_v23  ;;  %2835 = vmatpush3.bf16.xpose.msk.msra.mxu1 %vm3259_vm2, %v2809_v5  ;;  %v85_v39 = vld [vmem:[%s4307_s1] sm:$0xff]  ;;  %v86_v40 = vld [vmem:[%s4307_s1 + $0x8] sm:$0xff]  ;;  %v87_v42 = vld [vmem:[%s4307_s1 + $0x10] sm:$0xff] }
   0x8   :  { %2813 = vmatpush3.bf16.msra.mxu0 %v2812_v7  ;;  %2836 = vmatprep.subr.bf16.mxu1 %v4316_v0  ;;  %v3297_v41 = vpack.c.bf16 %v86_v40, %v85_v39  ;;  %v88_v43 = vld [vmem:[%s4307_s1 + $0x18] sm:$0xff]  ;;  %v89_v45 = vld [vmem:[%s4307_s1 + $0x20] sm:$0xff]  ;;  %v90_v46 = vld [vmem:[%s4307_s1 + $0x28] sm:$0xff] }
   0x9   :  { %2814 = vmatprep.subr.bf16.mxu0 %v4316_v0  ;;  %v3313_v44 = vpack.c.bf16 %v88_v43, %v87_v42  ;;  %v3327_v47 = vpack.c.bf16 %v90_v46, %v89_v45  ;;  %v91_v48 = vld [vmem:[%s4307_s1 + $0x30] sm:$0xff]  ;;  %v92_v49 = vld [vmem:[%s4307_s1 + $0x38] sm:$0xff]  ;;  %v93_v51 = vld [vmem:[%s4307_s1 + $0x40] sm:$0xff] }
   0xa   :  { %v3341_v50 = vpack.c.bf16 %v92_v49, %v91_v48  ;;  %v94_v52 = vld [vmem:[%s4307_s1 + $0x48] sm:$0xff]  ;;  %v95_v54 = vld [vmem:[%s4307_s1 + $0x50] sm:$0xff]  ;;  %v96_v55 = vld [vmem:[%s4307_s1 + $0x58] sm:$0xff] }
   0xb   :  { %v3355_v53 = vpack.c.bf16 %v94_v52, %v93_v51  ;;  %v3369_v56 = vpack.c.bf16 %v96_v55, %v95_v54  ;;  %v97_v57 = vld [vmem:[%s4307_s1 + $0x60] sm:$0xff]  ;;  %v98_v58 = vld [vmem:[%s4307_s1 + $0x68] sm:$0xff]  ;;  %v99_v60 = vld [vmem:[%s4307_s1 + $0x70] sm:$0xff] }
   0xc   :  { %2816 = vmatpush3.bf16.msra.mxu0 %v2815_v10  ;;  %v3383_v59 = vpack.c.bf16 %v98_v58, %v97_v57  ;;  %v100_v61 = vld [vmem:[%s4307_s1 + $0x78] sm:$0xff]  ;;  %v3415_v5 = vld [vmem:[%s4308_s4] sm:$0xff]  ;;  %v3480_v42 = vld [vmem:[%s4308_s4 + $0x50] sm:$0xff] }
   0xd   :  { %2817 = vmatprep.subr.bf16.mxu0 %v4316_v0  ;;  %v3402_v62 = vpack.c.bf16 %v100_v61, %v99_v60  ;;  %v3475_v40 = vld [vmem:[%s4308_s4 + $0x58] sm:$0xff]  ;;  %v3488_v51 = vld [vmem:[%s4308_s4 + $0x68] sm:$0xff]  ;;  %v3493_v52 = vld [vmem:[%s4308_s4 + $0x60] sm:$0xff] }
   0xe   :  { %v3501_v61 = vld [vmem:[%s4308_s4 + $0x78] sm:$0xff] }
   0xf   :  { %2839 = vmatpush3.bf16.xpose.msk.msra.mxu1 %vm3259_vm2, %v2812_v7 }
  0x10   :  { %2819 = vmatpush3.bf16.msra.mxu0 %v2818_v13  ;;  %2840 = vmatprep.subr.bf16.mxu1 %v4316_v0 }
  0x11   :  { %2820 = vmatprep.subr.bf16.mxu0 %v4316_v0 }
  0x14   :  { %2822 = vmatpush3.bf16.msra.mxu0 %v2821_v16 }
  0x15   :  { %2823 = vmatprep.subr.bf16.mxu0 %v4316_v0 }
  0x17   :  { %2843 = vmatpush3.bf16.xpose.msk.msra.mxu1 %vm3259_vm2, %v2815_v10  ;;  %v3424_v10 = vld [vmem:[%s4308_s4 + $0x18] sm:$0xff] }
  0x18   :  { %2825 = vmatpush3.bf16.msra.mxu0 %v2824_v19  ;;  %2844 = vmatprep.subr.bf16.mxu1 %v4316_v0 }
  0x19   :  { %2826 = vmatprep.subr.bf16.mxu0 %v4316_v0 }
  0x1c   :  { %2828 = vmatpush3.bf16.msra.mxu0 %v2827_v22 }
  0x1d   :  { %2829 = vmatprep.subr.bf16.mxu0 %v4316_v0 }
  0x1f   :  { %2847 = vmatpush3.bf16.xpose.msk.msra.mxu1 %vm3259_vm2, %v2818_v13 }
  0x20   :  { %2831 = vmatpush3.bf16.msra.mxu0 %v2830_v25  ;;  %2848 = vmatprep.subr.bf16.mxu1 %v4316_v0 }
  0x23   :  { %2377 = vmatmul.mubr.f32.vlgmr.msra.gmra.mrb[0].mxu0 %v3252_v26 }
  0x24   :  { %2416 = vmatprep.mubr.msk.f32.mxu0 %vm187_vm1, %v101_v1 }
  0x27   :  { %2851 = vmatpush3.bf16.xpose.msk.msra.mxu1 %vm3259_vm2, %v2821_v16 }
  0x28   :  { %2852 = vmatprep.subr.bf16.mxu1 %v4316_v0 }
  0x2f   :  { %2855 = vmatpush3.bf16.xpose.msk.msra.mxu1 %vm3259_vm2, %v2824_v19 }
  0x30   :  { %2856 = vmatprep.subr.bf16.mxu1 %v4316_v0 }
  0x37   :  { %2859 = vmatpush3.bf16.xpose.msk.msra.mxu1 %vm3259_vm2, %v2827_v22 }
  0x38   :  { %2860 = vmatprep.subr.bf16.mxu1 %v4316_v0 }
  0x3f   :  { %2863 = vmatpush3.bf16.xpose.msk.msra.mxu1 %vm3259_vm2, %v2830_v25  ;;  %v3454_v25 = vld [vmem:[%s4308_s4 + $0x30] sm:$0xff] }
  0x40   :  { %2888 = vmatprep.subr.bf16.mxu1 %v4316_v0 }
  0xf6   :  { %v183_v27 = vpop.f32.mrb[0].mxu0 }
  0xf7   :  { %v2378_v28 = vpop.f32.mrb[1].mxu0  ;;  %v188_v29 = vsel %vm187_vm1, %v183_v27, -inf }
  0xf8   :  { %189 = vmax.xlane.f32.xlu0 %v188_v29 }
 0x185   :  { %v190_v31 = vpop.xlane.xlu0 %189 }
 0x186   :  { %v191_v32 = vsub.f32 %v183_v27, %v190_v31 }
 0x188   :  { %v192_v33 = vmul.f32 1.442695, %v191_v32 }
 0x18a   :  { %3072 = vpow2.f32 %v192_v33  ;;  %v3462_v33 = vld [vmem:[%s4308_s4 + $0x48] sm:$0xff] }
 0x194   :  { %v3073_v34 = vpop.eup %3072 }
 0x195   :  { %v194_v35 = vsel %vm187_vm1, %v3073_v34, 0.0 }
 0x196   :  { %195 = vadd.xlane.f32.xlu0 %v194_v35 }
 0x223   :  { %v196_v36 = vpop.xlane.xlu0 %195 }
 0x224   :  { %3074 = vrcp.f32 %v196_v36 }
 0x22e   :  { %v3075_v37 = vpop.eup %3074 }
 0x22f   :  { %v198_v38 = vmul.f32 %v3075_v37, %v3073_v34  ;;  %v3467_v34 = vld [vmem:[%s4308_s4 + $0x40] sm:$0xff] }
 0x231   :  { %2412 = vmatmul.mubr.msk.f32.vlgmr.msra.gmra.mrb[0].mxu1 %vm187_vm1, %v198_v38  ;;  %2414 = vmatprep.subr.msk.mxu0 %vm187_vm1, %v198_v38 }
 0x232   :  { %2415 = vmatpush3.xpose.msk.msra.mxu0 %vm187_vm1, %v198_v38  ;;  %2507 = vmatprep.mubr.msk.f32.mxu1 %vm3090_vm0, %v4318_v4 }
 0x233   :  { %2864 = vmatprep.subr.bf16.mxu0 %v4316_v0 }
 0x235   :  { %2417 = vmatmul.mubr.msk.f32.vlgmr.msra.gmra.mrb[2].mxu0 %vm187_vm1, %v3150_v2 }
 0x236   :  { %2419 = vmatprep.mubr.msk.f32.mxu0 %vm187_vm1, %v3155_v3  ;;  %2866 = vmatpush3.bf16.msra.mxu0 %v3297_v41  ;;  %v3410_v3 = vld [vmem:[%s4308_s4 + $0x8] sm:$0xff] }
 0x237   :  { %2867 = vmatprep.subr.bf16.mxu0 %v4316_v0 }
 0x239   :  { %2420 = vmatmul.mubr.msk.f32.gmra.mrb[4].mxu0 %vm187_vm1, %v3163_v6 }
 0x23a   :  { %2422 = vmatprep.mubr.msk.f32.mxu0 %vm187_vm1, %v3174_v8  ;;  %2869 = vmatpush3.bf16.msra.mxu0 %v3313_v44 }
 0x23b   :  { %2870 = vmatprep.subr.bf16.mxu0 %v4316_v0 }
 0x23d   :  { %2423 = vmatmul.mubr.msk.f32.gmra.mrb[6].mxu0 %vm187_vm1, %v3179_v9 }
 0x23e   :  { %2425 = vmatprep.mubr.msk.f32.mxu0 %vm187_vm1, %v3187_v11  ;;  %2872 = vmatpush3.bf16.msra.mxu0 %v3327_v47  ;;  %v3429_v11 = vld [vmem:[%s4308_s4 + $0x10] sm:$0xff] }
 0x23f   :  { %2873 = vmatprep.subr.bf16.mxu0 %v4316_v0 }
 0x241   :  { %2426 = vmatmul.mubr.msk.f32.gmra.mrb[8].mxu0 %vm187_vm1, %v3192_v12 }
 0x242   :  { %2428 = vmatprep.mubr.msk.f32.mxu0 %vm187_vm1, %v3200_v14  ;;  %2875 = vmatpush3.bf16.msra.mxu0 %v3341_v50 }
 0x243   :  { %2876 = vmatprep.subr.bf16.mxu0 %v4316_v0 }
 0x245   :  { %2429 = vmatmul.mubr.msk.f32.gmra.mrb[10].mxu0 %vm187_vm1, %v3205_v15 }
 0x246   :  { %2431 = vmatprep.mubr.msk.f32.mxu0 %vm187_vm1, %v3213_v17  ;;  %2878 = vmatpush3.bf16.msra.mxu0 %v3355_v53  ;;  %v3436_v17 = vld [vmem:[%s4308_s4 + $0x28] sm:$0xff] }
 0x247   :  { %2879 = vmatprep.subr.bf16.mxu0 %v4316_v0 }
 0x249   :  { %2432 = vmatmul.mubr.msk.f32.gmra.mrb[12].mxu0 %vm187_vm1, %v3218_v18  ;;  %v3441_v18 = vld [vmem:[%s4308_s4 + $0x20] sm:$0xff] }
 0x24a   :  { %2434 = vmatprep.mubr.msk.f32.mxu0 %vm187_vm1, %v3226_v20  ;;  %2881 = vmatpush3.bf16.msra.mxu0 %v3369_v56 }
 0x24b   :  { %2882 = vmatprep.subr.bf16.mxu0 %v4316_v0 }
 0x24d   :  { %2435 = vmatmul.mubr.msk.f32.gmra.mrb[14].mxu0 %vm187_vm1, %v3231_v21 }
 0x24e   :  { %2437 = vmatprep.mubr.msk.f32.mxu0 %vm187_vm1, %v3239_v23  ;;  %2884 = vmatpush3.bf16.msra.mxu0 %v3383_v59 }
 0x24f   :  { %2885 = vmatprep.subr.bf16.mxu0 %v4316_v0 }
 0x251   :  { %2438 = vmatmul.mubr.msk.f32.gmra.mrb[16].mxu0 %vm187_vm1, %v3244_v24  ;;  %v3449_v24 = vld [vmem:[%s4308_s4 + $0x38] sm:$0xff] }
 0x252   :  { %2472 = vmatprep.mubr.msk.f32.mxu0 %vm3090_vm0, %v4318_v4  ;;  %2887 = vmatpush3.bf16.msra.mxu0 %v3402_v62 }
 0x253   :  { %2510 = vmatprep.subr.mxu0 %v4318_v4 }
 0x304   :  { %v316_v63 = vpop.f32.mrb[0].mxu1 }
 0x305   :  { %v320_v1 = vadd.f32 %v316_v63, %v3252_v26  ;;  %v2413_v2 = vpop.f32.mrb[1].mxu1  ;;  %v3506_v63 = vld [vmem:[%s4308_s4 + $0x70] sm:$0xff] }
 0x307   :  { %2473 = vmatmul.mubr.f32.vlgmr.msra.gmra.mrb[18].mxu0 %v320_v1 }
 0x308   :  { %v2418_v6 = vpop.f32.mrb[2].mxu0  ;;  %2512 = vmatprep.mubr.msk.f32.mxu0 %vm3090_vm0, %v4318_v4 }
 0x309   :  { %v467_v7 = vadd.f32 %v2418_v6, %v3410_v3  ;;  %v387_v8 = vpop.f32.mrb[3].mxu0 }
 0x30a   :  { %v466_v9 = vadd.f32 %v387_v8, %v3415_v5 }
 0x30c   :  { %v2889_v12 = vpack.c.bf16 %v467_v7, %v466_v9  ;;  %v2421_v13 = vpop.f32.mrb[4].mxu0 }
 0x30d   :  { %v469_v14 = vadd.f32 %v2421_v13, %v3424_v10  ;;  %v397_v15 = vpop.f32.mrb[5].mxu0  ;;  %v3092_v13 = vmov 0  }
 0x30e   :  { %v468_v16 = vadd.f32 %v397_v15, %v3429_v11  ;;  %2890 = vmatpush3.bf16.msra.mxu1 %v2889_v12  ;;  %v3515_v12 = vld [vmem:[%s4309_s5] sm:$0xff]  ;;  %3070 = vset.pattern.permute.xlu1 %v3092_v13 }
 0x30f   :  { %2891 = vmatprep.subr.bf16.mxu1 %v4316_v0  ;;  %3071 = vset.pattern.permute.xlu0 %v3092_v13 }
 0x310   :  { %v2892_v19 = vpack.c.bf16 %v469_v14, %v468_v16  ;;  %v2424_v20 = vpop.f32.mrb[6].mxu0  ;;  %v68_v14 = vld [vmem:[%s4310_s7] sm:$0xff] }
 0x311   :  { %v471_v21 = vadd.f32 %v2424_v20, %v3436_v17  ;;  %v407_v22 = vpop.f32.mrb[7].mxu0  ;;  %789 = vperm.xlu1 %3070, %v68_v14  }
 0x312   :  { %v470_v23 = vadd.f32 %v407_v22, %v3441_v18  ;;  %2893 = vmatpush3.bf16.msra.mxu1 %v2892_v19 }
 0x313   :  { %2894 = vmatprep.subr.bf16.mxu1 %v4316_v0 }
 0x314   :  { %v2895_v27 = vpack.c.bf16 %v471_v21, %v470_v23  ;;  %v2427_v28 = vpop.f32.mrb[8].mxu0 }
 0x315   :  { %v473_v29 = vadd.f32 %v2427_v28, %v3449_v24  ;;  %v417_v31 = vpop.f32.mrb[9].mxu0 }
 0x316   :  { %v472_v32 = vadd.f32 %v417_v31, %v3454_v25  ;;  %2896 = vmatpush3.bf16.msra.mxu1 %v2895_v27 }
 0x317   :  { %2897 = vmatprep.subr.bf16.mxu1 %v4316_v0 }
 0x318   :  { %v2898_v35 = vpack.c.bf16 %v473_v29, %v472_v32  ;;  %v2430_v36 = vpop.f32.mrb[10].mxu0 }
 0x319   :  { %v475_v37 = vadd.f32 %v2430_v36, %v3462_v33  ;;  %v427_v38 = vpop.f32.mrb[11].mxu0 }
 0x31a   :  { %v474_v39 = vadd.f32 %v427_v38, %v3467_v34  ;;  %2899 = vmatpush3.bf16.msra.mxu1 %v2898_v35  ;;  %v4315_v35 = vstv %s4311_s0 }
 0x31b   :  { %2900 = vmatprep.subr.bf16.mxu1 %v4316_v0 }
 0x31c   :  { %v2901_v43 = vpack.c.bf16 %v475_v37, %v474_v39  ;;  %v2433_v45 = vpop.f32.mrb[12].mxu0  ;;  %v3603_v39 = vld [vmem:[%s4305_s2 + $0xa8] sm:$0xff] }
 0x31d   :  { %v477_v46 = vadd.f32 %v2433_v45, %v3475_v40  ;;  %v437_v48 = vpop.f32.mrb[13].mxu0  ;;  %v3616_v45 = vld [vmem:[%s4305_s2 + $0xb0] sm:$0xff] }
 0x31e   :  { %v476_v49 = vadd.f32 %v437_v48, %v3480_v42  ;;  %2902 = vmatpush3.bf16.msra.mxu1 %v2901_v43 }
 0x31f   :  { %2903 = vmatprep.subr.bf16.mxu1 %v4316_v0 }
 0x320   :  { %v2904_v54 = vpack.c.bf16 %v477_v46, %v476_v49  ;;  %v2436_v55 = vpop.f32.mrb[14].mxu0  ;;  %v3621_v46 = vld [vmem:[%s4305_s2 + $0xb8] sm:$0xff]  ;;  %v3634_v49 = vld [vmem:[%s4305_s2 + $0xc0] sm:$0xff] }
 0x321   :  { %v479_v57 = vadd.f32 %v2436_v55, %v3488_v51  ;;  %v447_v58 = vpop.f32.mrb[15].mxu0  ;;  %v3625_v48 = vpack.c.bf16 %v3621_v46, %v3616_v45 }
 0x322   :  { %v478_v60 = vadd.f32 %v447_v58, %v3493_v52  ;;  %2905 = vmatpush3.bf16.msra.mxu1 %v2904_v54  ;;  %v3639_v54 = vld [vmem:[%s4305_s2 + $0xc8] sm:$0xff]  ;;  %v3657_v58 = vld [vmem:[%s4305_s2 + $0xd8] sm:$0xff] }
 0x323   :  { %2906 = vmatprep.subr.bf16.mxu1 %v4316_v0  ;;  %v3643_v55 = vpack.c.bf16 %v3639_v54, %v3634_v49 }
 0x324   :  { %v2907_v1 = vpack.c.bf16 %v479_v57, %v478_v60  ;;  %v2439_v2 = vpop.f32.mrb[16].mxu0  ;;  %v3652_v57 = vld [vmem:[%s4305_s2 + $0xd0] sm:$0xff] }
 0x325   :  { %v481_v6 = vadd.f32 %v2439_v2, %v3501_v61  ;;  %v457_v7 = vpop.f32.mrb[17].mxu0  ;;  %v3661_v60 = vpack.c.bf16 %v3657_v58, %v3652_v57  ;;  %v3675_v2 = vld [vmem:[%s4305_s2 + $0xe8] sm:$0xff] }
 0x326   :  { %v480_v8 = vadd.f32 %v457_v7, %v3506_v63  ;;  %2908 = vmatpush3.bf16.msra.mxu1 %v2907_v1  ;;  %v3670_v1 = vld [vmem:[%s4305_s2 + $0xe0] sm:$0xff] }
 0x327   :  { %2909 = vmatprep.subr.bf16.mxu1 %v4316_v0 }
 0x328   :  { %v2910_v9 = vpack.c.bf16 %v481_v6, %v480_v8  ;;  %v3679_v6 = vpack.c.bf16 %v3675_v2, %v3670_v1  ;;  %v3690_v8 = vld [vmem:[%s4305_s2 + $0xf0] sm:$0xff] }
 0x32a   :  { %2911 = vmatpush3.bf16.msra.mxu1 %v2910_v9  ;;  %v3695_v9 = vld [vmem:[%s4305_s2 + $0xf8] sm:$0xff] }
 0x32b   :  { %v3699_v14 = vpack.c.bf16 %v3695_v9, %v3690_v8 }
 0x32d   :  { %2508 = vmatmul.mubr.f32.vlgmr.msra.gmra.mrb[2].mxu1 %v3515_v12 }
 0x3da   :  { %v548_v15 = vpop.f32.mrb[18].mxu0 }
 0x3db   :  { %v553_v16 = vsel %vm552_vm3, %v548_v15, -inf  ;;  %v2474_v19 = vpop.f32.mrb[19].mxu0 }
 0x3dc   :  { %v554_v20 = vrot.slane %v553_v16, 4 }
 0x3de   :  { %v555_v21 = vmax.f32 %v553_v16, %v554_v20 }
 0x3e0   :  { %v556_v22 = vrot.slane %v555_v21, 2 }
 0x3e2   :  { %v557_v23 = vmax.f32 %v555_v21, %v556_v22 }
 0x3e4   :  { %v558_v27 = vrot.slane %v557_v23, 1 }
 0x3e6   :  { %v559_v28 = vmax.f32 %v557_v23, %v558_v27 }
 0x3e8   :  { %v560_v29 = vsub.f32 %v548_v15, %v559_v28 }
 0x3ea   :  { %v561_v31 = vmul.f32 1.442695, %v560_v29 }
 0x3ec   :  { %3076 = vpow2.f32 %v561_v31  ;;  %v3705_v31 = vpop.permute.xlu1 %789 }
 0x3f6   :  { %v3522_v32 = vpop.eup %3076 }
 0x3f7   :  { %2511 = vmatpush3.msra.mxu0 %v3522_v32  ;;  %v563_v7 = vsel %vm552_vm3, %v3522_v32, 0.0 }
 0x3f8   :  { %2912 = vmatprep.subr.bf16.mxu0 %v4316_v0  ;;  %v564_v13 = vrot.slane %v563_v7, 4 }
 0x3fa   :  { %v565_v15 = vadd.f32 %v564_v13, %v563_v7  ;;  %v3716_v7 = vld [vmem:[%s4312_s6 + $0x10] sm:$0xff]  ;;  %v3726_v13 = vld [vmem:[%s4312_s6 + $0x18] sm:$0xff] }
 0x3fb   :  { %4333 = vst [vmem:[#allocation3_spill] sm:$0xff] %v3726_v13 }
 0x3fc   :  { %v566_v16 = vrot.slane %v565_v15, 2 }
 0x3fe   :  { %v567_v19 = vadd.f32 %v566_v16, %v565_v15  ;;  %v3732_v15 = vld [vmem:[%s4312_s6 + $0x20] sm:$0xff]  ;;  %v3748_v16 = vld [vmem:[%s4312_s6 + $0x30] sm:$0xff] }
 0x3ff   :  { %4334 = vst [vmem:[#allocation4_spill] sm:$0xff] %v3732_v15  ;;  %4336 = vst [vmem:[#allocation6_spill] sm:$0xff] %v3748_v16 }
 0x400   :  { %v637_v36 = vpop.f32.mrb[2].mxu1  ;;  %v568_v20 = vrot.slane %v567_v19, 1 }
 0x401   :  { %v642_v37 = vmul.f32 %v4315_v35, %v637_v36  ;;  %v2509_v38 = vpop.f32.mrb[3].mxu1 }
 0x402   :  { %v569_v21 = vadd.f32 %v568_v20, %v567_v19  ;;  %v3711_v38 = vld [vmem:[%s4312_s6 + $0x8] sm:$0xff]  ;;  %v3764_v19 = vld [vmem:[%s4312_s6 + $0x40] sm:$0xff]  ;;  %v3780_v20 = vld [vmem:[%s4312_s6 + $0x50] sm:$0xff] }
 0x403   :  { %2513 = vmatmul.mubr.msk.f32.vlgmr.msra.gmra.mrb[20].mxu0 %vm187_vm1, %v642_v37  ;;  %4338 = vst [vmem:[#allocation8_spill] sm:$0xff] %v3764_v19 }
 0x404   :  { %2914 = vmatpush3.bf16.msra.mxu0 %v3297_v41  ;;  %2547 = vmatprep.mubr.msk.f32.mxu0 %vm3090_vm0, %v4318_v4  ;;  %v3558_v41 = vld [vmem:[%s4312_s6] sm:$0xff]  ;;  %3078 = vrcp.f32 %v569_v21 }
 0x405   :  { %2915 = vmatprep.subr.bf16.mxu0 %v4316_v0  ;;  %2552 = vmatprep.mubr.msk.f32.mxu1 %vm187_vm1, %v3558_v41  ;;  %v3796_v21 = vld [vmem:[%s4312_s6 + $0x60] sm:$0xff] }
 0x408   :  { %2917 = vmatpush3.bf16.msra.mxu0 %v3313_v44  ;;  %v3563_v44 = vld [vmem:[%s4305_s2 + $0x80] sm:$0xff] }
 0x409   :  { %2918 = vmatprep.subr.bf16.mxu0 %v4316_v0 }
 0x40c   :  { %2920 = vmatpush3.bf16.msra.mxu0 %v3327_v47  ;;  %v3568_v47 = vld [vmem:[%s4305_s2 + $0x88] sm:$0xff] }
 0x40d   :  { %2921 = vmatprep.subr.bf16.mxu0 %v4316_v0 }
 0x40e   :  { %v3079_v22 = vpop.eup %3078 }
 0x410   :  { %2923 = vmatpush3.bf16.msra.mxu0 %v3341_v50  ;;  %v2937_v50 = vpack.c.bf16 %v3568_v47, %v3563_v44 }
 0x411   :  { %2924 = vmatprep.subr.bf16.mxu0 %v4316_v0 }
 0x414   :  { %2926 = vmatpush3.bf16.msra.mxu0 %v3355_v53  ;;  %v3580_v53 = vld [vmem:[%s4305_s2 + $0x90] sm:$0xff] }
 0x415   :  { %2927 = vmatprep.subr.bf16.mxu0 %v4316_v0 }
 0x418   :  { %2929 = vmatpush3.bf16.msra.mxu0 %v3369_v56  ;;  %v3585_v56 = vld [vmem:[%s4305_s2 + $0x98] sm:$0xff] }
 0x419   :  { %2930 = vmatprep.subr.bf16.mxu0 %v4316_v0 }
 0x41c   :  { %2932 = vmatpush3.bf16.msra.mxu0 %v3383_v59  ;;  %v3589_v59 = vpack.c.bf16 %v3585_v56, %v3580_v53 }
 0x41d   :  { %2933 = vmatprep.subr.bf16.mxu0 %v4316_v0 }
 0x420   :  { %2935 = vmatpush3.bf16.msra.mxu0 %v3402_v62  ;;  %v3598_v62 = vld [vmem:[%s4305_s2 + $0xa0] sm:$0xff] }
 0x421   :  { %2960 = vmatprep.subr.bf16.mxu0 %v4316_v0  ;;  %v3607_v43 = vpack.c.bf16 %v3603_v39, %v3598_v62 }
 0x423   :  { %2548 = vmatmul.mubr.f32.vlgmr.msra.gmra.mrb[22].mxu0 %v3515_v12 }
 0x424   :  { %2643 = vmatprep.mubr.msk.f32.mxu0 %vm3090_vm0, %v4318_v4 }
 0x429   :  { %2963 = vmatpush3.bf16.xpose.msk.msra.mxu0 %vm3259_vm2, %v2937_v50 }
 0x42a   :  { %2964 = vmatprep.subr.bf16.mxu0 %v4316_v0 }
 0x431   :  { %2967 = vmatpush3.bf16.xpose.msk.msra.mxu0 %vm3259_vm2, %v3589_v59 }
 0x432   :  { %2968 = vmatprep.subr.bf16.mxu0 %v4316_v0 }
 0x439   :  { %2971 = vmatpush3.bf16.xpose.msk.msra.mxu0 %vm3259_vm2, %v3607_v43 }
 0x43a   :  { %2972 = vmatprep.subr.bf16.mxu0 %v4316_v0 }
 0x441   :  { %2975 = vmatpush3.bf16.xpose.msk.msra.mxu0 %vm3259_vm2, %v3625_v48 }
 0x442   :  { %2976 = vmatprep.subr.bf16.mxu0 %v4316_v0 }
 0x449   :  { %2979 = vmatpush3.bf16.xpose.msk.msra.mxu0 %vm3259_vm2, %v3643_v55 }
 0x44a   :  { %2980 = vmatprep.subr.bf16.mxu0 %v4316_v0 }
 0x451   :  { %2983 = vmatpush3.bf16.xpose.msk.msra.mxu0 %vm3259_vm2, %v3661_v60 }
 0x452   :  { %2984 = vmatprep.subr.bf16.mxu0 %v4316_v0 }
 0x459   :  { %2987 = vmatpush3.bf16.xpose.msk.msra.mxu0 %vm3259_vm2, %v3679_v6 }
 0x45a   :  { %2988 = vmatprep.subr.bf16.mxu0 %v4316_v0 }
 0x461   :  { %2991 = vmatpush3.bf16.xpose.msk.msra.mxu0 %vm3259_vm2, %v3699_v14 }
 0x462   :  { %3016 = vmatprep.subr.bf16.mxu0 %v4316_v0 }
 0x4d6   :  { %v712_v23 = vpop.f32.mrb[20].mxu0 }
 0x4d7   :  { %v716_v27 = vmul.f32 %v3079_v22, %v712_v23  ;;  %v2514_v28 = vpop.f32.mrb[21].mxu0  ;;  %v3812_v22 = vld [vmem:[%s4312_s6 + $0x70] sm:$0xff] }
 0x4d8   :  { %4341 = vst [vmem:[#allocation11_spill] sm:$0xff] %v3812_v22 }
 0x4f6   :  { %v783_v29 = vpop.f32.mrb[22].mxu0 }
 0x4f7   :  { %v784_v32 = vadd.f32 %v783_v29, %v716_v27  ;;  %v2549_v36 = vpop.f32.mrb[23].mxu0 }
 0x4f9   :  { %v792_v37 = vadd.f32 %v3705_v31, %v784_v32 }
 0x4fb   :  { %v793_v30 = vmax.f32 %v792_v37, 0.0 }
 0x4fd   :  { %2550 = vmatprep.subr.mxu1 %v793_v30 }
 0x4fe   :  { %2551 = vmatpush3.msra.mxu1 %v793_v30 }
 0x4ff   :  { %2553 = vmatmul.mubr.msk.f32.vlgmr.msra.gmra.mrb[4].mxu1 %vm187_vm1, %v3711_v38  ;;  %2936 = vmatprep.subr.bf16.mxu1 %v4316_v0 }
 0x500   :  { %2938 = vmatpush3.bf16.msra.mxu1 %v2937_v50  ;;  %2555 = vmatprep.mubr.msk.f32.mxu1 %vm187_vm1, %v3716_v7  ;;  %v3742_v50 = vld [vmem:[%s4312_s6 + $0x28] sm:$0xff] }
 0x501   :  { %2939 = vmatprep.subr.bf16.mxu1 %v4316_v0  ;;  %4335 = vst [vmem:[#allocation5_spill] sm:$0xff] %v3742_v50 }
 0x503   :  { %2556 = vmatmul.mubr.msk.f32.gmra.mrb[6].mxu1 %vm187_vm1, %v3726_v13 }
 0x504   :  { %2941 = vmatpush3.bf16.msra.mxu1 %v3589_v59  ;;  %2558 = vmatprep.mubr.msk.f32.mxu1 %vm187_vm1, %v3732_v15  ;;  %v3758_v59 = vld [vmem:[%s4312_s6 + $0x38] sm:$0xff] }
 0x505   :  { %2942 = vmatprep.subr.bf16.mxu1 %v4316_v0  ;;  %4337 = vst [vmem:[#allocation7_spill] sm:$0xff] %v3758_v59 }
 0x507   :  { %2559 = vmatmul.mubr.msk.f32.gmra.mrb[8].mxu1 %vm187_vm1, %v3742_v50  ;;  %v72_v50 = vld [vmem:[%s4313_s8 + $0x18] sm:$0xff] }
 0x508   :  { %2944 = vmatpush3.bf16.msra.mxu1 %v3607_v43  ;;  %2561 = vmatprep.mubr.msk.f32.mxu1 %vm187_vm1, %v3748_v16  ;;  %v3774_v43 = vld [vmem:[%s4312_s6 + $0x48] sm:$0xff] }
 0x509   :  { %2945 = vmatprep.subr.bf16.mxu1 %v4316_v0  ;;  %4339 = vst [vmem:[#allocation9_spill] sm:$0xff] %v3774_v43 }
 0x50b   :  { %2562 = vmatmul.mubr.msk.f32.gmra.mrb[10].mxu1 %vm187_vm1, %v3758_v59 }
 0x50c   :  { %2947 = vmatpush3.bf16.msra.mxu1 %v3625_v48  ;;  %2564 = vmatprep.mubr.msk.f32.mxu1 %vm187_vm1, %v3764_v19  ;;  %v3790_v48 = vld [vmem:[%s4312_s6 + $0x58] sm:$0xff] }
 0x50d   :  { %2948 = vmatprep.subr.bf16.mxu1 %v4316_v0 }
 0x50f   :  { %2565 = vmatmul.mubr.msk.f32.gmra.mrb[12].mxu1 %vm187_vm1, %v3774_v43 }
 0x510   :  { %2950 = vmatpush3.bf16.msra.mxu1 %v3643_v55  ;;  %2567 = vmatprep.mubr.msk.f32.mxu1 %vm187_vm1, %v3780_v20  ;;  %v3806_v55 = vld [vmem:[%s4312_s6 + $0x68] sm:$0xff] }
 0x511   :  { %2951 = vmatprep.subr.bf16.mxu1 %v4316_v0  ;;  %4340 = vst [vmem:[#allocation10_spill] sm:$0xff] %v3806_v55 }
 0x513   :  { %2568 = vmatmul.mubr.msk.f32.gmra.mrb[14].mxu1 %vm187_vm1, %v3790_v48 }
 0x514   :  { %2953 = vmatpush3.bf16.msra.mxu1 %v3661_v60  ;;  %2570 = vmatprep.mubr.msk.f32.mxu1 %vm187_vm1, %v3796_v21  ;;  %v3822_v60 = vld [vmem:[%s4312_s6 + $0x78] sm:$0xff] }
 0x515   :  { %2954 = vmatprep.subr.bf16.mxu1 %v4316_v0  ;;  %4342 = vst [vmem:[#allocation12_spill] sm:$0xff] %v3822_v60 }
 0x517   :  { %2571 = vmatmul.mubr.msk.f32.gmra.mrb[16].mxu1 %vm187_vm1, %v3806_v55 }
 0x518   :  { %2956 = vmatpush3.bf16.msra.mxu1 %v3679_v6  ;;  %2573 = vmatprep.mubr.msk.f32.mxu1 %vm187_vm1, %v3812_v22  ;;  %v74_v22 = vld [vmem:[%s4313_s8 + $0x28] sm:$0xff] }
 0x519   :  { %2957 = vmatprep.subr.bf16.mxu1 %v4316_v0 }
 0x51b   :  { %2574 = vmatmul.mubr.msk.f32.gmra.mrb[18].mxu1 %vm187_vm1, %v3822_v60  ;;  %v70_v60 = vld [vmem:[%s4313_s8 + $0x8] sm:$0xff] }
 0x51c   :  { %2959 = vmatpush3.bf16.msra.mxu1 %v3699_v14  ;;  %2608 = vmatprep.mubr.msk.f32.mxu1 %vm3090_vm0, %v4318_v4 }
 0x51f   :  { %2609 = vmatmul.mubr.f32.vlgmr.msra.gmra.mrb[20].mxu1 %v3252_v26 }
 0x520   :  { %2648 = vmatprep.mubr.msk.f32.mxu1 %vm187_vm1, %v3563_v44 }
 0x5d2   :  { %v2554_v6 = vpop.f32.mrb[4].mxu1 }
 0x5d3   :  { %v3833_v23 = vpop.f32.mrb[5].mxu1 }
 0x5d6   :  { %v2557_v27 = vpop.f32.mrb[6].mxu1 }
 0x5d7   :  { %v3835_v28 = vpop.f32.mrb[7].mxu1 }
 0x5da   :  { %v2560_v29 = vpop.f32.mrb[8].mxu1 }
 0x5db   :  { %v3837_v32 = vpop.f32.mrb[9].mxu1 }
 0x5de   :  { %v2563_v36 = vpop.f32.mrb[10].mxu1 }
 0x5df   :  { %v3839_v37 = vpop.f32.mrb[11].mxu1 }
 0x5e2   :  { %v2566_v14 = vpop.f32.mrb[12].mxu1 }
 0x5e3   :  { %v3841_v30 = vpop.f32.mrb[13].mxu1 }
 0x5e6   :  { %v2569_v35 = vpop.f32.mrb[14].mxu1 }
 0x5e7   :  { %v3843_v26 = vpop.f32.mrb[15].mxu1 }
 0x5ea   :  { %v2572_v0 = vpop.f32.mrb[16].mxu1 }
 0x5eb   :  { %v3845_v44 = vpop.f32.mrb[17].mxu1 }
 0x5ee   :  { %v2575_v4 = vpop.f32.mrb[18].mxu1 }
 0x5ef   :  { %v3847_v43 = vpop.f32.mrb[19].mxu1 }
 0x5f2   :  { %v1183_v19 = vpop.f32.mrb[20].mxu1 }
 0x5f3   :  { %v2610_v59 = vpop.f32.mrb[21].mxu1  ;;  %v1187_v16 = vsel %vm187_vm1, %v1183_v19, -inf }
 0x5f4   :  { %1188 = vmax.xlane.f32.xlu1 %v1187_v16  ;;  %v76_v59 = vld [vmem:[%s4313_s8 + $0x38] sm:$0xff]  ;;  %v78_v16 = vld [vmem:[%s4313_s8 + $0x48] sm:$0xff] }
 0x605   :  { %801 = vperm.xlu1 %3070, %v70_v60   ;;  %v80_v60 = vld [vmem:[%s4313_s8 + $0x58] sm:$0xff] }
 0x609   :  { %811 = vperm.xlu1 %3070, %v72_v50   ;;  %v82_v50 = vld [vmem:[%s4313_s8 + $0x68] sm:$0xff] }
 0x60d   :  { %821 = vperm.xlu1 %3070, %v74_v22   ;;  %v84_v22 = vld [vmem:[%s4313_s8 + $0x78] sm:$0xff] }
 0x611   :  { %831 = vperm.xlu1 %3070, %v76_v59  }
 0x615   :  { %841 = vperm.xlu1 %3070, %v78_v16  }
 0x619   :  { %851 = vperm.xlu1 %3070, %v80_v60  }
 0x61d   :  { %861 = vperm.xlu1 %3070, %v82_v50  }
 0x621   :  { %871 = vperm.xlu1 %3070, %v84_v22  }
 0x681   :  { %v1189_v59 = vpop.xlane.xlu1 %1188 }
 0x682   :  { %v1190_v15 = vsub.f32 %v1183_v19, %v1189_v59 }
 0x684   :  { %v1191_v55 = vmul.f32 1.442695, %v1190_v15 }
 0x685   :  { %v3874_v13 = vpop.permute.xlu1 %801 }
 0x686   :  { %3080 = vpow2.f32 %v1191_v55  ;;  %v994_v16 = vadd.f32 %v2554_v6, %v3874_v13 }
 0x688   :  { %1068 = vst.msk [vmem:[%s4314_s9 + $0x8] sm:$0xff] %vm552_vm3, %v994_v16 }
 0x689   :  { %v3881_v60 = vpop.permute.xlu1 %811 }
 0x68a   :  { %v1004_v50 = vadd.f32 %v2557_v27, %v3881_v60 }
 0x68c   :  { %1070 = vst.msk [vmem:[%s4314_s9 + $0x18] sm:$0xff] %vm552_vm3, %v1004_v50 }
 0x68d   :  { %v3888_v15 = vpop.permute.xlu1 %821 }
 0x68e   :  { %v1014_v19 = vadd.f32 %v2560_v29, %v3888_v15 }
 0x690   :  { %v3081_v55 = vpop.eup %3080  ;;  %1072 = vst.msk [vmem:[%s4314_s9 + $0x28] sm:$0xff] %vm552_vm3, %v1014_v19 }
 0x691   :  { %v3895_v6 = vpop.permute.xlu1 %831  ;;  %v1193_v22 = vsel %vm187_vm1, %v3081_v55, 0.0 }
 0x692   :  { %v1024_v27 = vadd.f32 %v2563_v36, %v3895_v6  ;;  %1194 = vadd.xlane.f32.xlu0 %v1193_v22 }
 0x694   :  { %1074 = vst.msk [vmem:[%s4314_s9 + $0x38] sm:$0xff] %vm552_vm3, %v1024_v27  ;;  %v73_v27 = vld [vmem:[%s4313_s8 + $0x20] sm:$0xff] }
 0x695   :  { %v3903_v59 = vpop.permute.xlu1 %841 }
 0x696   :  { %4343 = vst [vmem:[#allocation13_spill] sm:$0xff] %v3903_v59  ;;  %v1034_v29 = vadd.f32 %v2566_v14, %v3903_v59  ;;  %v2006_v59 = vld [vmem:[%s4307_s1 + $0x98] sm:$0xff] }
 0x698   :  { %1076 = vst.msk [vmem:[%s4314_s9 + $0x48] sm:$0xff] %vm552_vm3, %v1034_v29  ;;  %v77_v29 = vld [vmem:[%s4313_s8 + $0x40] sm:$0xff] }
 0x699   :  { %v3910_v16 = vpop.permute.xlu1 %851 }
 0x69a   :  { %v1044_v50 = vadd.f32 %v2569_v35, %v3910_v16  ;;  %v69_v35 = vld [vmem:[%s4313_s8] sm:$0xff] }
 0x69c   :  { %1078 = vst.msk [vmem:[%s4314_s9 + $0x58] sm:$0xff] %vm552_vm3, %v1044_v50  ;;  %v79_v50 = vld [vmem:[%s4313_s8 + $0x50] sm:$0xff] }
 0x69d   :  { %v3917_v36 = vpop.permute.xlu1 %861 }
 0x69e   :  { %v1054_v19 = vadd.f32 %v2572_v0, %v3917_v36  ;;  %v71_v0 = vld [vmem:[%s4313_s8 + $0x10] sm:$0xff] }
 0x6a0   :  { %1080 = vst.msk [vmem:[%s4314_s9 + $0x68] sm:$0xff] %vm552_vm3, %v1054_v19  ;;  %v81_v19 = vld [vmem:[%s4313_s8 + $0x60] sm:$0xff] }
 0x6a1   :  { %v3924_v14 = vpop.permute.xlu1 %871 }
 0x6a2   :  { %v1064_v22 = vadd.f32 %v2575_v4, %v3924_v14  ;;  %v75_v4 = vld [vmem:[%s4313_s8 + $0x30] sm:$0xff] }
 0x6a4   :  { %1082 = vst.msk [vmem:[%s4314_s9 + $0x78] sm:$0xff] %vm552_vm3, %v1064_v22  ;;  %v83_v22 = vld [vmem:[%s4313_s8 + $0x70] sm:$0xff] }
 0x6a8   :  { %796 = vperm.xlu0 %3071, %v69_v35  }
 0x6ac   :  { %806 = vperm.xlu0 %3071, %v71_v0  }
 0x6b0   :  { %816 = vperm.xlu0 %3071, %v73_v27  }
 0x6b4   :  { %826 = vperm.xlu0 %3071, %v75_v4  }
 0x6b8   :  { %836 = vperm.xlu0 %3071, %v77_v29  }
 0x6bc   :  { %846 = vperm.xlu0 %3071, %v79_v50  }
 0x6c0   :  { %856 = vperm.xlu0 %3071, %v81_v19   ;;  %v2003_v19 = vld [vmem:[%s4307_s1 + $0x80] sm:$0xff] }
 0x6c4   :  { %866 = vperm.xlu0 %3071, %v83_v22   ;;  %v2004_v22 = vld [vmem:[%s4307_s1 + $0x88] sm:$0xff] }
 0x71f   :  { %v1195_v35 = vpop.xlane.xlu0 %1194 }
 0x720   :  { %3082 = vrcp.f32 %v1195_v35  ;;  %v4344_v35 = vmov 0.0  }
 0x727   :  { %v3955_v0 = vpop.permute.xlu0 %796 }
 0x728   :  { %v989_v27 = vadd.f32 %v3833_v23, %v3955_v0 }
 0x72a   :  { %v3083_v4 = vpop.eup %3082  ;;  %1067 = vst.msk [vmem:[%s4314_s9] sm:$0xff] %vm552_vm3, %v989_v27 }
 0x72b   :  { %v1197_v29 = vmul.f32 %v3083_v4, %v3081_v55  ;;  %v3963_v50 = vpop.permute.xlu0 %806  ;;  %v3980_v55 = vpack.c.bf16 %v2004_v22, %v2003_v19  ;;  %v4345_v4 = vmov 0.0|0.0  }
 0x72c   :  { %v999_v23 = vadd.f32 %v3835_v28, %v3963_v50  ;;  %v2005_v28 = vld [vmem:[%s4307_s1 + $0x90] sm:$0xff] }
 0x72d   :  { %2644 = vmatmul.mubr.msk.f32.vlgmr.msra.gmra.mrb[24].mxu0 %vm187_vm1, %v1197_v29  ;;  %2646 = vmatprep.subr.msk.mxu1 %vm187_vm1, %v1197_v29  ;;  %v4004_v19 = vpack.c.bf16 %v2006_v59, %v2005_v28 }
 0x72e   :  { %1069 = vst.msk [vmem:[%s4314_s9 + $0x10] sm:$0xff] %vm552_vm3, %v999_v23  ;;  %2647 = vmatpush3.xpose.msk.msra.mxu1 %vm187_vm1, %v1197_v29  ;;  %2739 = vmatprep.mubr.msk.f32.mxu0 %vm3090_vm0, %v4344_v35 }
 0x72f   :  { %v3984_v27 = vpop.permute.xlu0 %816  ;;  %2992 = vmatprep.subr.bf16.mxu1 %v4345_v4 }
 0x730   :  { %v1009_v29 = vadd.f32 %v3837_v32, %v3984_v27  ;;  %v2008_v32 = vld [vmem:[%s4307_s1 + $0xa8] sm:$0xff] }
 0x731   :  { %2649 = vmatmul.mubr.msk.f32.vlgmr.msra.gmra.mrb[22].mxu1 %vm187_vm1, %v3568_v47  ;;  %v2007_v47 = vld [vmem:[%s4307_s1 + $0xa0] sm:$0xff] }
 0x732   :  { %1071 = vst.msk [vmem:[%s4314_s9 + $0x20] sm:$0xff] %vm552_vm3, %v1009_v29  ;;  %2651 = vmatprep.mubr.msk.f32.mxu1 %vm187_vm1, %v3580_v53  ;;  %2994 = vmatpush3.bf16.msra.mxu1 %v3980_v55  ;;  %v4026_v53 = vpack.c.bf16 %v2008_v32, %v2007_v47 }
 0x733   :  { %v4006_v22 = vpop.permute.xlu0 %826  ;;  %2995 = vmatprep.subr.bf16.mxu1 %v4345_v4 }
 0x734   :  { %v1019_v23 = vadd.f32 %v3839_v37, %v4006_v22  ;;  %v2010_v37 = vld [vmem:[%s4307_s1 + $0xb8] sm:$0xff] }
 0x735   :  { %2652 = vmatmul.mubr.msk.f32.gmra.mrb[24].mxu1 %vm187_vm1, %v3585_v56  ;;  %v2009_v56 = vld [vmem:[%s4307_s1 + $0xb0] sm:$0xff] }
 0x736   :  { %1073 = vst.msk [vmem:[%s4314_s9 + $0x30] sm:$0xff] %vm552_vm3, %v1019_v23  ;;  %2654 = vmatprep.mubr.msk.f32.mxu1 %vm187_vm1, %v3598_v62  ;;  %2997 = vmatpush3.bf16.msra.mxu1 %v4004_v19  ;;  %v4048_v62 = vpack.c.bf16 %v2010_v37, %v2009_v56 }
 0x737   :  { %v4028_v59 = vpop.permute.xlu0 %836  ;;  %2998 = vmatprep.subr.bf16.mxu1 %v4345_v4 }
 0x738   :  { %v1029_v28 = vadd.f32 %v3841_v30, %v4028_v59  ;;  %v2012_v30 = vld [vmem:[%s4307_s1 + $0xc8] sm:$0xff] }
 0x739   :  { %2655 = vmatmul.mubr.msk.f32.gmra.mrb[26].mxu1 %vm187_vm1, %v3603_v39  ;;  %v2011_v39 = vld [vmem:[%s4307_s1 + $0xc0] sm:$0xff] }
 0x73a   :  { %1075 = vst.msk [vmem:[%s4314_s9 + $0x40] sm:$0xff] %vm552_vm3, %v1029_v28  ;;  %2657 = vmatprep.mubr.msk.f32.mxu1 %vm187_vm1, %v3616_v45  ;;  %3000 = vmatpush3.bf16.msra.mxu1 %v4026_v53  ;;  %v4070_v45 = vpack.c.bf16 %v2012_v30, %v2011_v39 }
 0x73b   :  { %v4050_v29 = vpop.permute.xlu0 %846  ;;  %3001 = vmatprep.subr.bf16.mxu1 %v4345_v4 }
 0x73c   :  { %v1039_v47 = vadd.f32 %v3843_v26, %v4050_v29  ;;  %v2014_v26 = vld [vmem:[%s4307_s1 + $0xd8] sm:$0xff] }
 0x73d   :  { %2658 = vmatmul.mubr.msk.f32.gmra.mrb[28].mxu1 %vm187_vm1, %v3621_v46  ;;  %v2013_v46 = vld [vmem:[%s4307_s1 + $0xd0] sm:$0xff] }
 0x73e   :  { %1077 = vst.msk [vmem:[%s4314_s9 + $0x50] sm:$0xff] %vm552_vm3, %v1039_v47  ;;  %2660 = vmatprep.mubr.msk.f32.mxu1 %vm187_vm1, %v3634_v49  ;;  %3003 = vmatpush3.bf16.msra.mxu1 %v4048_v62  ;;  %v4092_v49 = vpack.c.bf16 %v2014_v26, %v2013_v46 }
 0x73f   :  { %v4072_v32 = vpop.permute.xlu0 %856  ;;  %3004 = vmatprep.subr.bf16.mxu1 %v4345_v4 }
 0x740   :  { %v1049_v23 = vadd.f32 %v3845_v44, %v4072_v32  ;;  %v2016_v44 = vld [vmem:[%s4307_s1 + $0xe8] sm:$0xff] }
 0x741   :  { %2661 = vmatmul.mubr.msk.f32.gmra.mrb[30].mxu1 %vm187_vm1, %v3639_v54  ;;  %v2015_v54 = vld [vmem:[%s4307_s1 + $0xe0] sm:$0xff] }
 0x742   :  { %1079 = vst.msk [vmem:[%s4314_s9 + $0x60] sm:$0xff] %vm552_vm3, %v1049_v23  ;;  %2663 = vmatprep.mubr.msk.f32.mxu1 %vm187_vm1, %v3652_v57  ;;  %3006 = vmatpush3.bf16.msra.mxu1 %v4070_v45  ;;  %v4114_v57 = vpack.c.bf16 %v2016_v44, %v2015_v54 }
 0x743   :  { %v4094_v56 = vpop.permute.xlu0 %866  ;;  %3007 = vmatprep.subr.bf16.mxu1 %v4345_v4 }
 0x744   :  { %v1059_v37 = vadd.f32 %v3847_v43, %v4094_v56 }
 0x745   :  { %2664 = vmatmul.mubr.msk.f32.gmra.mrb[32].mxu1 %vm187_vm1, %v3657_v58  ;;  %v2017_v58 = vld [vmem:[%s4307_s1 + $0xf0] sm:$0xff] }
 0x746   :  { %1081 = vst.msk [vmem:[%s4314_s9 + $0x70] sm:$0xff] %vm552_vm3, %v1059_v37  ;;  %2666 = vmatprep.mubr.msk.f32.mxu1 %vm187_vm1, %v3670_v1  ;;  %3009 = vmatpush3.bf16.msra.mxu1 %v4092_v49  ;;  %v2018_v1 = vld [vmem:[%s4307_s1 + $0xf8] sm:$0xff] }
 0x747   :  { %3010 = vmatprep.subr.bf16.mxu1 %v4345_v4 }
 0x749   :  { %2667 = vmatmul.mubr.msk.f32.gmra.mrb[34].mxu1 %vm187_vm1, %v3675_v2  ;;  %v4133_v2 = vpack.c.bf16 %v2018_v1, %v2017_v58 }
 0x74a   :  { %2669 = vmatprep.mubr.msk.f32.mxu1 %vm187_vm1, %v3690_v8  ;;  %3012 = vmatpush3.bf16.msra.mxu1 %v4114_v57 }
 0x74b   :  { %3013 = vmatprep.subr.bf16.mxu1 %v4345_v4 }
 0x74d   :  { %2670 = vmatmul.mubr.msk.f32.gmra.mrb[36].mxu1 %vm187_vm1, %v3695_v9  ;;  %v3088_v9 = vld [vmem:[%s4306_s3] sm:$0xff] }
 0x74e   :  { %2704 = vmatprep.mubr.msk.f32.mxu1 %vm3090_vm0, %v4344_v35  ;;  %3015 = vmatpush3.bf16.msra.mxu1 %v4133_v2 }
 0x74f   :  { %2742 = vmatprep.subr.mxu1 %v4344_v35 }
 0x800   :  { %v1315_v8 = vpop.f32.mrb[24].mxu0 }
 0x801   :  { %v1319_v43 = vadd.f32 %v3088_v9, %v1315_v8  ;;  %v2645_v28 = vpop.f32.mrb[25].mxu0 }
 0x803   :  { %2705 = vmatmul.mubr.f32.vlgmr.msra.gmra.mrb[38].mxu1 %v1319_v43 }
 0x804   :  { %v2650_v39 = vpop.f32.mrb[22].mxu1  ;;  %2744 = vmatprep.mubr.msk.f32.mxu1 %vm3090_vm0, %v4344_v35 }
 0x805   :  { %v1466_v30 = vadd.f32 %v2650_v39, %v3410_v3  ;;  %v1386_v47 = vpop.f32.mrb[23].mxu1 }
 0x806   :  { %v1465_v46 = vadd.f32 %v1386_v47, %v3415_v5 }
 0x808   :  { %v3017_v26 = vpack.c.bf16 %v1466_v30, %v1465_v46  ;;  %v2653_v23 = vpop.f32.mrb[24].mxu1 }
 0x809   :  { %v1468_v54 = vadd.f32 %v2653_v23, %v3424_v10  ;;  %v1396_v44 = vpop.f32.mrb[25].mxu1 }
 0x80a   :  { %v1467_v37 = vadd.f32 %v1396_v44, %v3429_v11  ;;  %3018 = vmatpush3.bf16.msra.mxu0 %v3017_v26 }
 0x80b   :  { %3019 = vmatprep.subr.bf16.mxu0 %v4345_v4 }
 0x80c   :  { %v3020_v58 = vpack.c.bf16 %v1468_v54, %v1467_v37  ;;  %v2656_v1 = vpop.f32.mrb[26].mxu1 }
 0x80d   :  { %v1470_v8 = vadd.f32 %v2656_v1, %v3436_v17  ;;  %v1406_v9 = vpop.f32.mrb[27].mxu1 }
 0x80e   :  { %v1469_v3 = vadd.f32 %v1406_v9, %v3441_v18  ;;  %3021 = vmatpush3.bf16.msra.mxu0 %v3020_v58 }
 0x80f   :  { %3022 = vmatprep.subr.bf16.mxu0 %v4345_v4 }
 0x810   :  { %v3023_v5 = vpack.c.bf16 %v1470_v8, %v1469_v3  ;;  %v2659_v43 = vpop.f32.mrb[28].mxu1 }
 0x811   :  { %v1472_v10 = vadd.f32 %v2659_v43, %v3449_v24  ;;  %v1416_v28 = vpop.f32.mrb[29].mxu1 }
 0x812   :  { %v1471_v11 = vadd.f32 %v1416_v28, %v3454_v25  ;;  %3024 = vmatpush3.bf16.msra.mxu0 %v3023_v5 }
 0x813   :  { %3025 = vmatprep.subr.bf16.mxu0 %v4345_v4 }
 0x814   :  { %v3026_v39 = vpack.c.bf16 %v1472_v10, %v1471_v11  ;;  %v2662_v30 = vpop.f32.mrb[30].mxu1 }
 0x815   :  { %v1474_v17 = vadd.f32 %v2662_v30, %v3462_v33  ;;  %v1426_v47 = vpop.f32.mrb[31].mxu1 }
 0x816   :  { %v1473_v18 = vadd.f32 %v1426_v47, %v3467_v34  ;;  %3027 = vmatpush3.bf16.msra.mxu0 %v3026_v39 }
 0x817   :  { %3028 = vmatprep.subr.bf16.mxu0 %v4345_v4 }
 0x818   :  { %v3029_v46 = vpack.c.bf16 %v1474_v17, %v1473_v18  ;;  %v2665_v26 = vpop.f32.mrb[32].mxu1 }
 0x819   :  { %v1476_v24 = vadd.f32 %v2665_v26, %v3475_v40  ;;  %v1436_v23 = vpop.f32.mrb[33].mxu1 }
 0x81a   :  { %v1475_v25 = vadd.f32 %v1436_v23, %v3480_v42  ;;  %3030 = vmatpush3.bf16.msra.mxu0 %v3029_v46 }
 0x81b   :  { %3031 = vmatprep.subr.bf16.mxu0 %v4345_v4 }
 0x81c   :  { %v3032_v54 = vpack.c.bf16 %v1476_v24, %v1475_v25  ;;  %v2668_v44 = vpop.f32.mrb[34].mxu1 }
 0x81d   :  { %v1478_v33 = vadd.f32 %v2668_v44, %v3488_v51  ;;  %v1446_v37 = vpop.f32.mrb[35].mxu1  ;;  %v4350_v44 = vld [vmem:[#allocation11_spill] sm:$0xff] }
 0x81e   :  { %v1477_v34 = vadd.f32 %v1446_v37, %v3493_v52  ;;  %3033 = vmatpush3.bf16.msra.mxu0 %v3032_v54  ;;  %v4349_v54 = vld [vmem:[#allocation4_spill] sm:$0xff]  ;;  %v4356_v37 = vld [vmem:[#allocation9_spill] sm:$0xff] }
 0x81f   :  { %3034 = vmatprep.subr.bf16.mxu0 %v4345_v4 }
 0x820   :  { %v3035_v58 = vpack.c.bf16 %v1478_v33, %v1477_v34  ;;  %v2671_v1 = vpop.f32.mrb[36].mxu1  ;;  %v4355_v33 = vld [vmem:[#allocation8_spill] sm:$0xff] }
 0x821   :  { %v1480_v40 = vadd.f32 %v2671_v1, %v3501_v61  ;;  %v1456_v8 = vpop.f32.mrb[37].mxu1 }
 0x822   :  { %v1479_v42 = vadd.f32 %v1456_v8, %v3506_v63  ;;  %3036 = vmatpush3.bf16.msra.mxu0 %v3035_v58 }
 0x823   :  { %3037 = vmatprep.subr.bf16.mxu0 %v4345_v4 }
 0x824   :  { %v3038_v9 = vpack.c.bf16 %v1480_v40, %v1479_v42 }
 0x826   :  { %3039 = vmatpush3.bf16.msra.mxu0 %v3038_v9 }
 0x829   :  { %2740 = vmatmul.mubr.f32.vlgmr.msra.gmra.mrb[26].mxu0 %v3515_v12 }
 0x82a   :  { %2784 = vmatprep.mubr.msk.f32.mxu0 %vm187_vm1, %v3558_v41  ;;  %v4346_v41 = vstv %s4311_s0 }
 0x8d6   :  { %v1547_v51 = vpop.f32.mrb[38].mxu1 }
 0x8d7   :  { %v1551_v52 = vsel %vm552_vm3, %v1547_v51, -inf  ;;  %v2706_v3 = vpop.f32.mrb[39].mxu1 }
 0x8d8   :  { %v1552_v5 = vrot.slane %v1551_v52, 4 }
 0x8da   :  { %v1553_v43 = vmax.f32 %v1551_v52, %v1552_v5 }
 0x8dc   :  { %v1554_v61 = vrot.slane %v1553_v43, 2 }
 0x8de   :  { %v1555_v10 = vmax.f32 %v1553_v43, %v1554_v61 }
 0x8e0   :  { %v1556_v28 = vrot.slane %v1555_v10, 1 }
 0x8e2   :  { %v1557_v63 = vmax.f32 %v1555_v10, %v1556_v28 }
 0x8e4   :  { %v1558_v11 = vsub.f32 %v1547_v51, %v1557_v63 }
 0x8e6   :  { %v1559_v39 = vmul.f32 1.442695, %v1558_v11 }
 0x8e8   :  { %3084 = vpow2.f32 %v1559_v39  ;;  %v4357_v39 = vld [vmem:[#allocation13_spill] sm:$0xff] }
 0x8f2   :  { %v3085_v30 = vpop.eup %3084 }
 0x8f3   :  { %2743 = vmatpush3.msra.mxu1 %v3085_v30 }
 0x8f4   :  { %3040 = vmatprep.subr.bf16.mxu1 %v4345_v4 }
 0x8fc   :  { %v1635_v17 = vpop.f32.mrb[26].mxu0 }
 0x8fd   :  { %v1639_v47 = vmul.f32 %v1635_v17, %v4346_v41  ;;  %v2741_v18 = vpop.f32.mrb[27].mxu0 }
 0x8ff   :  { %2745 = vmatmul.mubr.msk.f32.vlgmr.msra.gmra.mrb[40].mxu1 %vm187_vm1, %v1639_v47 }
 0x900   :  { %3042 = vmatpush3.bf16.msra.mxu1 %v3980_v55  ;;  %2779 = vmatprep.mubr.msk.f32.mxu1 %vm3090_vm0, %v4344_v35  ;;  %v1561_v55 = vsel %vm552_vm3, %v3085_v30, 0.0 }
 0x901   :  { %3043 = vmatprep.subr.bf16.mxu1 %v4345_v4  ;;  %v1562_v35 = vrot.slane %v1561_v55, 4 }
 0x904   :  { %3045 = vmatpush3.bf16.msra.mxu1 %v4004_v19  ;;  %v1563_v19 = vadd.f32 %v1562_v35, %v1561_v55 }
 0x905   :  { %3046 = vmatprep.subr.bf16.mxu1 %v4345_v4 }
 0x908   :  { %3048 = vmatpush3.bf16.msra.mxu1 %v4026_v53  ;;  %v1564_v53 = vrot.slane %v1563_v19, 2 }
 0x909   :  { %3049 = vmatprep.subr.bf16.mxu1 %v4345_v4 }
 0x90c   :  { %3051 = vmatpush3.bf16.msra.mxu1 %v4048_v62  ;;  %v1565_v62 = vadd.f32 %v1564_v53, %v1563_v19 }
 0x90d   :  { %3052 = vmatprep.subr.bf16.mxu1 %v4345_v4 }
 0x910   :  { %3054 = vmatpush3.bf16.msra.mxu1 %v4070_v45  ;;  %v1566_v45 = vrot.slane %v1565_v62, 1 }
 0x911   :  { %3055 = vmatprep.subr.bf16.mxu1 %v4345_v4 }
 0x914   :  { %3057 = vmatpush3.bf16.msra.mxu1 %v4092_v49  ;;  %v1567_v49 = vadd.f32 %v1566_v45, %v1565_v62 }
 0x915   :  { %3058 = vmatprep.subr.bf16.mxu1 %v4345_v4 }
 0x916   :  { %3086 = vrcp.f32 %v1567_v49 }
 0x918   :  { %3060 = vmatpush3.bf16.msra.mxu1 %v4114_v57 }
 0x919   :  { %3061 = vmatprep.subr.bf16.mxu1 %v4345_v4 }
 0x91c   :  { %3063 = vmatpush3.bf16.msra.mxu1 %v4133_v2 }
 0x91f   :  { %2780 = vmatmul.mubr.f32.vlgmr.msra.gmra.mrb[42].mxu1 %v3515_v12 }
 0x920   :  { %2799 = vmatprep.mubr.msk.f32.mxu1 %vm187_vm1, %v3780_v20  ;;  %v3087_v46 = vpop.eup %3086  ;;  %v4347_v20 = vld [vmem:[#allocation3_spill] sm:$0xff] }
 0x9d2   :  { %v1709_v57 = vpop.f32.mrb[40].mxu1 }
 0x9d3   :  { %v1713_v26 = vmul.f32 %v3087_v46, %v1709_v57  ;;  %v2746_v4 = vpop.f32.mrb[41].mxu1 }
 0x9f2   :  { %v1780_v24 = vpop.f32.mrb[42].mxu1 }
 0x9f3   :  { %v1781_v2 = vadd.f32 %v1780_v24, %v1713_v26  ;;  %v2781_v23 = vpop.f32.mrb[43].mxu1 }
 0x9f5   :  { %v1784_v12 = vadd.f32 %v1781_v2, %v3705_v31  ;;  %v4348_v31 = vld [vmem:[#allocation10_spill] sm:$0xff] }
 0x9f7   :  { %v1785_v25 = vmax.f32 %v1784_v12, 0.0 }
 0x9f9   :  { %2782 = vmatprep.subr.mxu0 %v1785_v25  ;;  %3064 = vmatprep.subr.mxu1 %v1785_v25 }
 0x9fa   :  { %2783 = vmatpush3.msra.mxu0 %v1785_v25  ;;  %3065 = vmatpush3.msra.mxu1 %v1785_v25 }
 0x9fb   :  { %2785 = vmatmul.mubr.msk.f32.vlgmr.msra.gmra.mrb[28].mxu0 %vm187_vm1, %v3711_v38  ;;  %2800 = vmatmul.mubr.msk.f32.vlgmr.msra.gmra.mrb[44].mxu1 %vm187_vm1, %v3790_v48  ;;  %v4351_v38 = vld [vmem:[#allocation5_spill] sm:$0xff]  ;;  %v4352_v48 = vld [vmem:[#allocation12_spill] sm:$0xff] }
 0x9fc   :  { %2787 = vmatprep.mubr.msk.f32.mxu0 %vm187_vm1, %v3716_v7  ;;  %2802 = vmatprep.mubr.msk.f32.mxu1 %vm187_vm1, %v3796_v21  ;;  %v4353_v7 = vld [vmem:[#allocation6_spill] sm:$0xff]  ;;  %v4354_v21 = vld [vmem:[#allocation7_spill] sm:$0xff] }
 0x9ff   :  { %2788 = vmatmul.mubr.msk.f32.gmra.mrb[30].mxu0 %vm187_vm1, %v4347_v20  ;;  %2803 = vmatmul.mubr.msk.f32.gmra.mrb[46].mxu1 %vm187_vm1, %v4348_v31 }
 0xa00   :  { %2790 = vmatprep.mubr.msk.f32.mxu0 %vm187_vm1, %v4349_v54  ;;  %2805 = vmatprep.mubr.msk.f32.mxu1 %vm187_vm1, %v4350_v44 }
 0xa03   :  { %2791 = vmatmul.mubr.msk.f32.gmra.mrb[32].mxu0 %vm187_vm1, %v4351_v38  ;;  %2806 = vmatmul.mubr.msk.f32.gmra.mrb[48].mxu1 %vm187_vm1, %v4352_v48 }
 0xa04   :  { %2793 = vmatprep.mubr.msk.f32.mxu0 %vm187_vm1, %v4353_v7 }
 0xa07   :  { %2794 = vmatmul.mubr.msk.f32.gmra.mrb[34].mxu0 %vm187_vm1, %v4354_v21 }
 0xa08   :  { %2796 = vmatprep.mubr.msk.f32.mxu0 %vm187_vm1, %v4355_v33 }
 0xa0b   :  { %2797 = vmatmul.mubr.msk.f32.gmra.mrb[36].mxu0 %vm187_vm1, %v4356_v37 }
 0xace   :  { %v2786_v34 = vpop.f32.mrb[28].mxu0  ;;  %v2801_v58 = vpop.f32.mrb[44].mxu1 }
 0xacf   :  { %v1858_v1 = vadd.f32 %v2786_v34, %v3874_v13  ;;  %v1908_v40 = vadd.f32 %v2801_v58, %v3910_v16  ;;  %v1852_v8 = vpop.f32.mrb[29].mxu0  ;;  %v1902_v42 = vpop.f32.mrb[45].mxu1 }
 0xad0   :  { %v1853_v9 = vadd.f32 %v1852_v8, %v3955_v0  ;;  %v1903_v51 = vadd.f32 %v1902_v42, %v4050_v29 }
 0xad1   :  { %2087 = vst.msk [vmem:[%s4314_s9 + $0x88] sm:$0xff] %vm552_vm3, %v1858_v1  ;;  %2097 = vst.msk [vmem:[%s4314_s9 + $0xd8] sm:$0xff] %vm552_vm3, %v1908_v40 }
 0xad2   :  { %2086 = vst.msk [vmem:[%s4314_s9 + $0x80] sm:$0xff] %vm552_vm3, %v1853_v9  ;;  %2096 = vst.msk [vmem:[%s4314_s9 + $0xd0] sm:$0xff] %vm552_vm3, %v1903_v51  ;;  %v2789_v13 = vpop.f32.mrb[30].mxu0  ;;  %v2804_v16 = vpop.f32.mrb[46].mxu1 }
 0xad3   :  { %v1868_v0 = vadd.f32 %v2789_v13, %v3881_v60  ;;  %v1918_v29 = vadd.f32 %v2804_v16, %v3917_v36  ;;  %v1862_v52 = vpop.f32.mrb[31].mxu0  ;;  %v1912_v3 = vpop.f32.mrb[47].mxu1 }
 0xad4   :  { %v1863_v5 = vadd.f32 %v1862_v52, %v3963_v50  ;;  %v1913_v43 = vadd.f32 %v1912_v3, %v4072_v32 }
 0xad5   :  { %2089 = vst.msk [vmem:[%s4314_s9 + $0x98] sm:$0xff] %vm552_vm3, %v1868_v0  ;;  %2099 = vst.msk [vmem:[%s4314_s9 + $0xe8] sm:$0xff] %vm552_vm3, %v1918_v29 }
 0xad6   :  { %2088 = vst.msk [vmem:[%s4314_s9 + $0x90] sm:$0xff] %vm552_vm3, %v1863_v5  ;;  %2098 = vst.msk [vmem:[%s4314_s9 + $0xe0] sm:$0xff] %vm552_vm3, %v1913_v43  ;;  %v2792_v60 = vpop.f32.mrb[32].mxu0  ;;  %v2807_v36 = vpop.f32.mrb[48].mxu1 }
 0xad7   :  { %v1878_v50 = vadd.f32 %v2792_v60, %v3888_v15  ;;  %v1928_v32 = vadd.f32 %v2807_v36, %v3924_v14  ;;  %v1872_v61 = vpop.f32.mrb[33].mxu0  ;;  %v1922_v10 = vpop.f32.mrb[49].mxu1 }
 0xad8   :  { %v1873_v28 = vadd.f32 %v1872_v61, %v3984_v27  ;;  %v1923_v63 = vadd.f32 %v1922_v10, %v4094_v56 }
 0xad9   :  { %2091 = vst.msk [vmem:[%s4314_s9 + $0xa8] sm:$0xff] %vm552_vm3, %v1878_v50  ;;  %2101 = vst.msk [vmem:[%s4314_s9 + $0xf8] sm:$0xff] %vm552_vm3, %v1928_v32 }
 0xada   :  { %2090 = vst.msk [vmem:[%s4314_s9 + $0xa0] sm:$0xff] %vm552_vm3, %v1873_v28  ;;  %2100 = vst.msk [vmem:[%s4314_s9 + $0xf0] sm:$0xff] %vm552_vm3, %v1923_v63  ;;  %v2795_v15 = vpop.f32.mrb[34].mxu0 }
 0xadb   :  { %v1888_v14 = vadd.f32 %v2795_v15, %v3895_v6  ;;  %v1882_v27 = vpop.f32.mrb[35].mxu0 }
 0xadc   :  { %v1883_v56 = vadd.f32 %v1882_v27, %v4006_v22 }
 0xadd   :  { %2093 = vst.msk [vmem:[%s4314_s9 + $0xb8] sm:$0xff] %vm552_vm3, %v1888_v14 }
 0xade   :  { %2092 = vst.msk [vmem:[%s4314_s9 + $0xb0] sm:$0xff] %vm552_vm3, %v1883_v56  ;;  %v2798_v11 = vpop.f32.mrb[36].mxu0 }
 0xadf   :  { %v1898_v30 = vadd.f32 %v2798_v11, %v4357_v39  ;;  %v1892_v17 = vpop.f32.mrb[37].mxu0 }
 0xae0   :  { %v1893_v41 = vadd.f32 %v1892_v17, %v4028_v59 }
 0xae1   :  { %2095 = vst.msk [vmem:[%s4314_s9 + $0xc8] sm:$0xff] %vm552_vm3, %v1898_v30 }
 0xae2   :  { %2094 = vst.msk [vmem:[%s4314_s9 + $0xc0] sm:$0xff] %vm552_vm3, %v1893_v41 }

</bundles_post_ra>
